<compile_context>
chip_gen: v6e
topology: v6e:2x2x1
jax: 0.10.0
libtpu: 0.0.40
codegen_flags: <defaults>
</compile_context>

<pallas_src>
import functools

import jax
import jax.numpy as jnp
from jax.experimental import pallas as pl
from jax.experimental.pallas import tpu as pltpu


def _round_up(x, m):
    return (x + m - 1) // m * m


# --------------------------------------------------------------------------------------
# Kernel: one HGCN layer (GCN aggregation over all meta paths + semantic attention),
# optionally fused with the final log_softmax. Grid = (row tiles, contraction tiles).
# --------------------------------------------------------------------------------------
def hgcn_layer_kernel(h_ref, a_ref, wcat_ref, bcat_ref, w1_ref, b1_ref, w2_ref,
                      out_ref, acc_ref, *, num_meta, d_pad, d_actual,
                      apply_log_softmax):
    """Blocks seen by the kernel at grid point (i, k):

      h_ref    : (TK, Dp)        bf16  node features of the k-tile (streamed)
      a_ref    : (M, TN, TK)     bf16  normalized adjacency tile per meta-path
      wcat_ref : (Dp, M*Dp)      bf16  GCN weights, meta paths concatenated on lanes
      bcat_ref : (1, M*Dp)       f32   GCN biases (same lane layout)
      w1_ref   : (Dp, SAp)       bf16  attention projection weight
      b1_ref   : (1, SAp)        f32   attention projection bias
      w2_ref   : (1, SAp)        f32   attention score vector (row layout)
      out_ref  : (TN, Dp)              layer output row tile (bf16, or f32+log_softmax last layer)
      acc_ref  : (TN, M*Dp)      f32   VMEM accumulator, resident across the k axis
    """
    k = pl.program_id(1)
    nk = pl.num_programs(1)

    @pl.when(k == 0)
    def _init():
        acc_ref[...] = jnp.zeros_like(acc_ref)

    # Streamed feature transform for this k-tile: one MXU matmul for all meta paths.
    xw = jnp.dot(h_ref[...], wcat_ref[...],
                 preferred_element_type=jnp.float32).astype(jnp.bfloat16)   # (TK, M*Dp)

    # Aggregation: acc[:, m-block] += A_m[i-tile, k-tile] @ XW_m.
    # Lane slices are 128-aligned (d_pad % 128 == 0) -> free views, no shuffles.
    for m in range(num_meta):                                   # static unroll, M small
        lo = m * d_pad
        acc_ref[:, lo:lo + d_pad] += jnp.dot(
            a_ref[m], xw[:, lo:lo + d_pad], preferred_element_type=jnp.float32)

    @pl.when(k == nk - 1)
    def _finalize():
        w1 = w1_ref[...]                                        # (Dp, SAp) bf16
        b1 = b1_ref[...]                                        # (1, SAp)  f32
        w2 = w2_ref[...]                                        # (1, SAp)  f32

        zs, ss = [], []
        for m in range(num_meta):
            lo = m * d_pad
            z_m = acc_ref[:, lo:lo + d_pad] + bcat_ref[:, lo:lo + d_pad]   # (TN, Dp) f32
            zs.append(z_m)
            p = jnp.tanh(jnp.dot(z_m.astype(jnp.bfloat16), w1,
                                 preferred_element_type=jnp.float32) + b1)  # (TN, SAp)
            # VPU multiply + lane reduce instead of a 1-lane-wide matmul.
            ss.append(jnp.sum(p * w2, axis=-1, keepdims=True))              # (TN, 1)

        # Exact per-node softmax over meta paths (sigmoid form when M == 2).
        if num_meta == 2:
            beta0 = 1.0 / (1.0 + jnp.exp(ss[1] - ss[0]))
            betas = [beta0, 1.0 - beta0]
        else:
            mx = ss[0]
            for m in range(1, num_meta):
                mx = jnp.maximum(mx, ss[m])
            es = [jnp.exp(s - mx) for s in ss]
            den = es[0]
            for m in range(1, num_meta):
                den = den + es[m]
            inv = 1.0 / den                                     # exact; (TN, 1) is tiny
            betas = [e * inv for e in es]

        h_new = betas[0] * zs[0]
        for m in range(1, num_meta):
            h_new = h_new + betas[m] * zs[m]                    # (TN, Dp) f32

        if apply_log_softmax:
            # F.log_softmax over the real hidden dim only (padded lanes excluded).
            if d_actual < d_pad:
                lane = jax.lax.broadcasted_iota(jnp.int32, h_new.shape, 1)
                hm = jnp.where(lane < d_actual, h_new, -1e30)
            else:
                hm = h_new
            mx = jnp.max(hm, axis=1, keepdims=True)
            lse = jnp.log(jnp.sum(jnp.exp(hm - mx), axis=1, keepdims=True)) + mx
            out_ref[...] = (h_new - lse).astype(out_ref.dtype)
        else:
            out_ref[...] = h_new.astype(out_ref.dtype)


# --------------------------------------------------------------------------------------
# Per-layer pallas_call wrapper.
# --------------------------------------------------------------------------------------
def _hgcn_layer(h, a, wcat, bcat, w1, b1, w2, *, num_meta, d_pad, d_actual,
                tn, tk, last_layer):
    n_p, dp = h.shape
    num_i = n_p // tn
    num_k = n_p // tk
    sa = w1.shape[-1]
    out_dtype = jnp.float32 if last_layer else jnp.bfloat16

    kernel = functools.partial(
        hgcn_layer_kernel, num_meta=num_meta, d_pad=d_pad, d_actual=d_actual,
        apply_log_softmax=last_layer)

    flops = (2 * num_i * n_p * dp * num_meta * dp      # streamed XW (recomputed per row tile)
             + 2 * num_meta * n_p * n_p * dp           # A @ XW aggregation
             + 2 * num_meta * n_p * dp * sa)           # attention projection
    transcendentals = num_meta * n_p * sa + 4 * n_p    # tanh + softmax exps / final exp
    bytes_accessed = (num_meta * n_p * n_p * 2         # A_hat (bf16, dominant stream)
                      + num_i * n_p * dp * 2           # h streamed per row tile (bf16)
                      + n_p * dp * (4 if last_layer else 2)
                      + wcat.size * 2 + w1.size * 2
                      + (bcat.size + b1.size + w2.size) * 4)

    grid_spec = pltpu.PrefetchScalarGridSpec(
        num_scalar_prefetch=0,
        grid=(num_i, num_k),                                   # reduction axis last
        in_specs=[
            pl.BlockSpec((tk, dp), lambda i, k: (k, 0)),                   # h (k-tile)
            pl.BlockSpec((num_meta, tn, tk), lambda i, k: (0, i, k)),      # A_hat tile
            pl.BlockSpec(wcat.shape, lambda i, k: (0, 0)),                 # layer params
            pl.BlockSpec(bcat.shape, lambda i, k: (0, 0)),
            pl.BlockSpec(w1.shape, lambda i, k: (0, 0)),
            pl.BlockSpec(b1.shape, lambda i, k: (0, 0)),
            pl.BlockSpec(w2.shape, lambda i, k: (0, 0)),
        ],
        out_specs=pl.BlockSpec((tn, dp), lambda i, k: (i, 0)),
        scratch_shapes=[pltpu.VMEM((tn, num_meta * d_pad), jnp.float32)],
    )

    return pl.pallas_call(
        kernel,
        out_shape=jax.ShapeDtypeStruct((n_p, dp), out_dtype),
        grid_spec=grid_spec,
        compiler_params=pltpu.CompilerParams(
            # row axis parallel (uses both v7x TensorCores); contraction axis arbitrary.
            dimension_semantics=("parallel", "arbitrary"),
            # above v5e's 16 MiB default; well under v7x's 64 MiB physical VMEM.
            vmem_limit_bytes=32 * 1024 * 1024),
        cost_estimate=pl.CostEstimate(flops=flops, transcendentals=transcendentals,
                                      bytes_accessed=bytes_accessed),
    )(h, a, wcat, bcat, w1, b1, w2)


# --------------------------------------------------------------------------------------
# Full HGCN forward (all layers). Layout plumbing (lane padding, weight concat, bf16
# casts) is one-off wrapper work.
# --------------------------------------------------------------------------------------
def hgcn_forward(h0, a_hat, w, b, w1, b1, w2, *, tile=256):
    """h0    : (N, D)            f32  embedded node features
       a_hat : (M, N, N)         f32  normalized adjacency per meta-path
       w     : (L, M, D, D)      f32  GCN weights (embed_dim == hidden_size in the module)
       b     : (L, M, D)         f32  GCN biases
       w1    : (L, D, SA)        f32  semantic-attention projection weight
       b1    : (L, SA)           f32  semantic-attention projection bias
       w2    : (L, SA, 1)        f32  semantic-attention score vector
    """
    num_layers, num_meta, din, dout = w.shape
    assert din == dout
    n, _ = h0.shape
    sa = w1.shape[-1]
    d = dout
    dp = _round_up(d, 128)          # lane-dense hidden dim (free on MXU/VPU, unmasked vst)
    sap = _round_up(sa, 128)

    # Tile selection: full blocks for tiny graphs, (tile x tile) A tiles otherwise.
    assert tile % 128 == 0
    n_small = _round_up(n, 8)
    if n_small <= tile:
        n_p, tn, tk = n_small, n_small, n_small
    else:
        n_p = _round_up(n, tile)
        tn = tk = tile

    # Pad / repack parameters (zero padding keeps padded lanes exactly zero through layers).
    wp = jnp.zeros((num_layers, num_meta, dp, dp), jnp.float32).at[:, :, :d, :d].set(w)
    wcat = jnp.transpose(wp, (0, 2, 1, 3)).reshape(num_layers, dp, num_meta * dp)
    wcat = wcat.astype(jnp.bfloat16)                                        # (L, Dp, M*Dp)
    bcat = jnp.zeros((num_layers, num_meta, dp), jnp.float32).at[:, :, :d].set(b)
    bcat = bcat.reshape(num_layers, 1, num_meta * dp)                       # (L, 1, M*Dp)
    w1p = jnp.zeros((num_layers, dp, sap), jnp.float32).at[:, :d, :sa].set(w1)
    w1p = w1p.astype(jnp.bfloat16)                                          # (L, Dp, SAp)
    b1p = jnp.zeros((num_layers, 1, sap), jnp.float32).at[:, 0, :sa].set(b1)
    w2p = jnp.zeros((num_layers, 1, sap), jnp.float32).at[:, 0, :sa].set(w2[:, :, 0])

    a_p = jnp.zeros((num_meta, n_p, n_p), jnp.float32).at[:, :n, :n].set(a_hat)
    a_p = a_p.astype(jnp.bfloat16)
    h = jnp.zeros((n_p, dp), jnp.float32).at[:n, :d].set(h0).astype(jnp.bfloat16)

    for l in range(num_layers):
        h = _hgcn_layer(h, a_p, wcat[l], bcat[l], w1p[l], b1p[l], w2p[l],
                        num_meta=num_meta, d_pad=dp, d_actual=d,
                        tn=tn, tk=tk, last_layer=(l == num_layers - 1))

    return h[:n, :d]


# --------------------------------------------------------------------------------------
# Glue: dense GCN normalization (add_remaining_self_loops semantics) + pure-JAX reference.
# --------------------------------------------------------------------------------------
def gcn_norm_dense(edge_index, num_nodes):
    """A_hat = D^-1/2 (A + I) D^-1/2 matching torch_geometric GCNConv(normalize=True)."""
    src, dst = edge_index[0], edge_index[1]
    not_loop = (src != dst).astype(jnp.float32)
    adj = jnp.zeros((num_nodes, num_nodes), jnp.float32)
    adj = adj.at[dst, src].add(not_loop)                  # message: src (col) -> dst (row)
    adj = adj + jnp.eye(num_nodes, dtype=jnp.float32)     # add_remaining_self_loops, weight 1
    deg = jnp.sum(adj, axis=1)
    dis = jnp.where(deg > 0, jax.lax.rsqrt(deg), 0.0)
    return adj * dis[:, None] * dis[None, :]


def hgcn_reference(h0, a_hat, w, b, w1, b1, w2):
    """Pure-JAX f32 reference of the torch forward, for correctness checking."""
    num_layers, num_meta = w.shape[0], w.shape[1]
    h = h0
    for l in range(num_layers):
        zs = [a_hat[m] @ (h @ w[l, m]) + b[l, m][None, :] for m in range(num_meta)]
        z = jnp.stack(zs, axis=1)                           # (N, M, D)
        p = jnp.tanh(z @ w1[l] + b1[l])                     # (N, M, SA)
        s = p @ w2[l]                                       # (N, M, 1)
        beta = jax.nn.softmax(s, axis=1)
        h = jnp.sum(beta * z, axis=1)                       # (N, D)
    return jax.nn.log_softmax(h, axis=1)


if __name__ == "__main__":
    # Small shapes consistent with the module (embed_dim == hidden_size in torch __init__).
    N_NODES = 160      # number of graph nodes (not a multiple of 128 -> exercises padding)
    NODE_SIZE = 50     # embedding vocabulary
    HIDDEN = 32        # hidden_size == embed_dim
    EDGE_TYPES = 2     # num meta paths
    LAYERS = 2
    NUM_CLASS = 4      # classifier is defined in __init__ but unused in forward
    SA_HIDDEN = 128    # SemanticAttention hidden size
    N_EDGES = 640

    key = jax.random.PRNGKey(0)
    keys = jax.random.split(key, 24)
    ki = 0

    embed_table = jax.random.normal(keys[ki], (NODE_SIZE, HIDDEN), jnp.float32) * 0.1; ki += 1

    w_list, b_list, w1_list, b1_list, w2_list = [], [], [], [], []
    for _ in range(LAYERS):
        w_list.append(jax.random.normal(keys[ki], (EDGE_TYPES, HIDDEN, HIDDEN), jnp.float32)
                      / jnp.sqrt(HIDDEN)); ki += 1
        b_list.append(jnp.zeros((EDGE_TYPES, HIDDEN), jnp.float32))
        w1_list.append(jax.random.normal(keys[ki], (HIDDEN, SA_HIDDEN), jnp.float32)
                       / jnp.sqrt(HIDDEN)); ki += 1
        b1_list.append(jnp.zeros((SA_HIDDEN,), jnp.float32))
        w2_list.append(jax.random.normal(keys[ki], (SA_HIDDEN, 1), jnp.float32)
                       / jnp.sqrt(SA_HIDDEN)); ki += 1
    w = jnp.stack(w_list)          # (L, M, D, D)
    b = jnp.stack(b_list)          # (L, M, D)
    w1 = jnp.stack(w1_list)        # (L, D, SA)
    b1 = jnp.stack(b1_list)        # (L, SA)
    w2 = jnp.stack(w2_list)        # (L, SA, 1)

    # Classifier weights exist in the torch module but are never used in forward().
    _classifier_w = jax.random.normal(keys[ki], (HIDDEN, NUM_CLASS), jnp.float32); ki += 1

    # Inputs: node ids and edge_index per meta path.
    x = jax.random.randint(keys[ki], (N_NODES, 1), 0, NODE_SIZE); ki += 1
    edge_indexes = []
    for _ in range(EDGE_TYPES):
        e_src = jax.random.randint(keys[ki], (N_EDGES,), 0, N_NODES); ki += 1
        e_dst = jax.random.randint(keys[ki], (N_EDGES,), 0, N_NODES); ki += 1
        edge_indexes.append(jnp.stack([e_src, e_dst]))

    # Glue: embedding lookup (= self.embed(x).squeeze()) and GCN normalization.
    h0 = jnp.take(embed_table, x[:, 0], axis=0)                              # (N, HIDDEN)
    a_hat = jnp.stack([gcn_norm_dense(ei, N_NODES) for ei in edge_indexes])  # (M, N, N)

    # Tiled HGCN stack: tile=128 -> padded N=256, grid (2, 2) per layer (exercises the
    # accumulator / pl.when path even at this toy size).
    out = jax.block_until_ready(hgcn_forward(h0, a_hat, w, b, w1, b1, w2, tile=128))

    # Correctness checks against the pure-JAX f32 reference.
    ref = hgcn_reference(h0, a_hat, w, b, w1, b1, w2)
    assert out.shape == (N_NODES, HIDDEN)
    assert bool(jnp.all(jnp.isfinite(out)))
    assert bool(jnp.allclose(jnp.sum(jnp.exp(out), axis=1), 1.0, atol=1e-3))
    max_err = float(jnp.max(jnp.abs(out - ref)))
    assert max_err < 0.1, f"max abs err vs reference: {max_err}"
    print("KERNEL_OK")
</pallas_src>

<mosaic_0001>
module attributes {stable_mosaic.version = 11 : i64} {
  func.func @hgcn_layer_kernel(%arg0: i32, %arg1: i32, %arg2: memref<128x128xbf16, #tpu.memory_space<vmem>>, %arg3: memref<2x128x128xbf16, #tpu.memory_space<vmem>>, %arg4: memref<128x256xbf16, #tpu.memory_space<vmem>>, %arg5: memref<1x256xf32, #tpu.memory_space<vmem>>, %arg6: memref<128x128xbf16, #tpu.memory_space<vmem>>, %arg7: memref<1x128xf32, #tpu.memory_space<vmem>>, %arg8: memref<1x128xf32, #tpu.memory_space<vmem>>, %arg9: memref<128x128xbf16, #tpu.memory_space<vmem>>, %arg10: memref<128x256xf32, #tpu.memory_space<vmem>>) attributes {dimension_semantics = [#tpu.dimension_semantics<parallel>, #tpu.dimension_semantics<arbitrary>], iteration_bounds = array<i64: 2, 2>, scalar_prefetch = 0 : i64, scratch_operands = 1 : i64, tpu.core_type = #tpu.core_type<tc>, window_params = [{transform_indices = @transform_0, window_bounds = array<i64: 128, 128>}, {transform_indices = @transform_1, window_bounds = array<i64: 2, 128, 128>}, {pipeline_mode = #tpu.pipeline_mode<synchronous>, transform_indices = @transform_2, window_bounds = array<i64: 128, 256>}, {pipeline_mode = #tpu.pipeline_mode<synchronous>, transform_indices = @transform_3, window_bounds = array<i64: 1, 256>}, {pipeline_mode = #tpu.pipeline_mode<synchronous>, transform_indices = @transform_4, window_bounds = array<i64: 128, 128>}, {pipeline_mode = #tpu.pipeline_mode<synchronous>, transform_indices = @transform_5, window_bounds = array<i64: 1, 128>}, {pipeline_mode = #tpu.pipeline_mode<synchronous>, transform_indices = @transform_6, window_bounds = array<i64: 1, 128>}, {transform_indices = @transform_7, window_bounds = array<i64: 128, 128>}]} {
    %c0_i32 = arith.constant 0 : i32
    %0 = arith.cmpi eq, %arg1, %c0_i32 : i32
    %1 = arith.extui %0 : i1 to i32
    %c0_i32_0 = arith.constant 0 : i32
    %2 = arith.cmpi ne, %1, %c0_i32_0 : i32
    scf.if %2 {
      %cst_19 = arith.constant 0.000000e+00 : f32
      %24 = vector.broadcast %cst_19 : f32 to vector<128x256xf32>
      %c0_20 = arith.constant 0 : index
      %c0_21 = arith.constant 0 : index
      %25 = vector.load %arg10[%c0_20, %c0_21] : memref<128x256xf32, #tpu.memory_space<vmem>>, vector<128x256xf32>
      tpu.vector_store %arg10[%c0_20, %c0_21], %24 {strides = array<i32>} : memref<128x256xf32, #tpu.memory_space<vmem>>, vector<128x256xf32>,
    } else {
    }
    %c0 = arith.constant 0 : index
    %c0_1 = arith.constant 0 : index
    %3 = vector.load %arg2[%c0, %c0_1] : memref<128x128xbf16, #tpu.memory_space<vmem>>, vector<128x128xbf16>
    %c0_2 = arith.constant 0 : index
    %c0_3 = arith.constant 0 : index
    %4 = vector.load %arg4[%c0_2, %c0_3] : memref<128x256xbf16, #tpu.memory_space<vmem>>, vector<128x256xbf16>
    %cst = arith.constant dense<0.000000e+00> : vector<128x256xf32>
    %5 = tpu.matmul %3, %4, %cst {dimension_numbers = #tpu.dot_dimension_numbers<[1], [0], [0], [1], [0, 0, 1, 1], [], []>} : vector<128x128xbf16>, vector<128x256xbf16>, vector<128x256xf32> -> vector<128x256xf32>
    %6 = arith.truncf %5 : vector<128x256xf32> to vector<128x256xbf16>
    %c0_4 = arith.constant 0 : index
    %c0_5 = arith.constant 0 : index
    %7 = vector.load %arg10[%c0_4, %c0_5] : memref<128x256xf32, #tpu.memory_space<vmem>>, vector<128x128xf32>
    %c0_6 = arith.constant 0 : index
    %c0_7 = arith.constant 0 : index
    %c0_8 = arith.constant 0 : index
    %8 = vector.load %arg3[%c0_6, %c0_7, %c0_8] : memref<2x128x128xbf16, #tpu.memory_space<vmem>>, vector<1x128x128xbf16>
    %9 = vector.shape_cast %8 : vector<1x128x128xbf16> to vector<128x128xbf16>
    %10 = vector.extract_strided_slice %6 {offsets = [0, 0], sizes = [128, 128], strides = [1, 1]} : vector<128x256xbf16> to vector<128x128xbf16>
    %cst_9 = arith.constant dense<0.000000e+00> : vector<128x128xf32>
    %11 = tpu.matmul %9, %10, %cst_9 {dimension_numbers = #tpu.dot_dimension_numbers<[1], [0], [0], [1], [0, 0, 1, 1], [], []>} : vector<128x128xbf16>, vector<128x128xbf16>, vector<128x128xf32> -> vector<128x128xf32>
    %12 = arith.addf %7, %11 : vector<128x128xf32>
    %c0_10 = arith.constant 0 : index
    %c0_11 = arith.constant 0 : index
    %13 = vector.load %arg10[%c0_10, %c0_11] : memref<128x256xf32, #tpu.memory_space<vmem>>, vector<128x128xf32>
    tpu.vector_store %arg10[%c0_10, %c0_11], %12 {strides = array<i32>} : memref<128x256xf32, #tpu.memory_space<vmem>>, vector<128x128xf32>,
    %c0_12 = arith.constant 0 : index
    %c128 = arith.constant 128 : index
    %14 = vector.load %arg10[%c0_12, %c128] : memref<128x256xf32, #tpu.memory_space<vmem>>, vector<128x128xf32>
    %c1 = arith.constant 1 : index
    %c0_13 = arith.constant 0 : index
    %c0_14 = arith.constant 0 : index
    %15 = vector.load %arg3[%c1, %c0_13, %c0_14] : memref<2x128x128xbf16, #tpu.memory_space<vmem>>, vector<1x128x128xbf16>
    %16 = vector.shape_cast %15 : vector<1x128x128xbf16> to vector<128x128xbf16>
    %17 = vector.extract_strided_slice %6 {offsets = [0, 128], sizes = [128, 128], strides = [1, 1]} : vector<128x256xbf16> to vector<128x128xbf16>
    %cst_15 = arith.constant dense<0.000000e+00> : vector<128x128xf32>
    %18 = tpu.matmul %16, %17, %cst_15 {dimension_numbers = #tpu.dot_dimension_numbers<[1], [0], [0], [1], [0, 0, 1, 1], [], []>} : vector<128x128xbf16>, vector<128x128xbf16>, vector<128x128xf32> -> vector<128x128xf32>
    %19 = arith.addf %14, %18 : vector<128x128xf32>
    %c0_16 = arith.constant 0 : index
    %c128_17 = arith.constant 128 : index
    %20 = vector.load %arg10[%c0_16, %c128_17] : memref<128x256xf32, #tpu.memory_space<vmem>>, vector<128x128xf32>
    tpu.vector_store %arg10[%c0_16, %c128_17], %19 {strides = array<i32>} : memref<128x256xf32, #tpu.memory_space<vmem>>, vector<128x128xf32>,
    %c1_i32 = arith.constant 1 : i32
    %21 = arith.cmpi eq, %arg1, %c1_i32 : i32
    %22 = arith.extui %21 : i1 to i32
    %c0_i32_18 = arith.constant 0 : i32
    %23 = arith.cmpi ne, %22, %c0_i32_18 : i32
    scf.if %23 {
      %c0_19 = arith.constant 0 : index
      %c0_20 = arith.constant 0 : index
      %24 = vector.load %arg6[%c0_19, %c0_20] : memref<128x128xbf16, #tpu.memory_space<vmem>>, vector<128x128xbf16>
      %c0_21 = arith.constant 0 : index
      %c0_22 = arith.constant 0 : index
      %25 = vector.load %arg7[%c0_21, %c0_22] : memref<1x128xf32, #tpu.memory_space<vmem>>, vector<1x128xf32>
      %c0_23 = arith.constant 0 : index
      %c0_24 = arith.constant 0 : index
      %26 = vector.load %arg8[%c0_23, %c0_24] : memref<1x128xf32, #tpu.memory_space<vmem>>, vector<1x128xf32>
      %c0_25 = arith.constant 0 : index
      %c0_26 = arith.constant 0 : index
      %27 = vector.load %arg10[%c0_25, %c0_26] : memref<128x256xf32, #tpu.memory_space<vmem>>, vector<128x128xf32>
      %c0_27 = arith.constant 0 : index
      %c0_28 = arith.constant 0 : index
      %28 = vector.load %arg5[%c0_27, %c0_28] : memref<1x256xf32, #tpu.memory_space<vmem>>, vector<1x128xf32>
      %29 = vector.broadcast %28 : vector<1x128xf32> to vector<128x128xf32>
      %30 = arith.addf %27, %29 : vector<128x128xf32>
      %31 = arith.truncf %30 : vector<128x128xf32> to vector<128x128xbf16>
      %cst_29 = arith.constant dense<0.000000e+00> : vector<128x128xf32>
      %32 = tpu.matmul %31, %24, %cst_29 {dimension_numbers = #tpu.dot_dimension_numbers<[1], [0], [0], [1], [0, 0, 1, 1], [], []>} : vector<128x128xbf16>, vector<128x128xbf16>, vector<128x128xf32> -> vector<128x128xf32>
      %33 = vector.broadcast %25 : vector<1x128xf32> to vector<128x128xf32>
      %34 = arith.addf %32, %33 : vector<128x128xf32>
      %35 = math.tanh %34 : vector<128x128xf32>
      %36 = vector.broadcast %26 : vector<1x128xf32> to vector<128x128xf32>
      %37 = arith.mulf %35, %36 : vector<128x128xf32>
      %cst_30 = arith.constant dense<0.000000e+00> : vector<128xf32>
      %38 = vector.multi_reduction <add>, %37, %cst_30 [1] : vector<128x128xf32> to vector<128xf32>
      %39 = vector.shape_cast %38 : vector<128xf32> to vector<128x1xf32>
      %c0_31 = arith.constant 0 : index
      %c128_32 = arith.constant 128 : index
      %40 = vector.load %arg10[%c0_31, %c128_32] : memref<128x256xf32, #tpu.memory_space<vmem>>, vector<128x128xf32>
      %c0_33 = arith.constant 0 : index
      %c128_34 = arith.constant 128 : index
      %41 = vector.load %arg5[%c0_33, %c128_34] : memref<1x256xf32, #tpu.memory_space<vmem>>, vector<1x128xf32>
      %42 = vector.broadcast %41 : vector<1x128xf32> to vector<128x128xf32>
      %43 = arith.addf %40, %42 : vector<128x128xf32>
      %44 = arith.truncf %43 : vector<128x128xf32> to vector<128x128xbf16>
      %cst_35 = arith.constant dense<0.000000e+00> : vector<128x128xf32>
      %45 = tpu.matmul %44, %24, %cst_35 {dimension_numbers = #tpu.dot_dimension_numbers<[1], [0], [0], [1], [0, 0, 1, 1], [], []>} : vector<128x128xbf16>, vector<128x128xbf16>, vector<128x128xf32> -> vector<128x128xf32>
      %46 = vector.broadcast %25 : vector<1x128xf32> to vector<128x128xf32>
      %47 = arith.addf %45, %46 : vector<128x128xf32>
      %48 = math.tanh %47 : vector<128x128xf32>
      %49 = vector.broadcast %26 : vector<1x128xf32> to vector<128x128xf32>
      %50 = arith.mulf %48, %49 : vector<128x128xf32>
      %cst_36 = arith.constant dense<0.000000e+00> : vector<128xf32>
      %51 = vector.multi_reduction <add>, %50, %cst_36 [1] : vector<128x128xf32> to vector<128xf32>
      %52 = vector.shape_cast %51 : vector<128xf32> to vector<128x1xf32>
      %53 = arith.subf %52, %39 : vector<128x1xf32>
      %54 = math.exp %53 : vector<128x1xf32>
      %cst_37 = arith.constant 1.000000e+00 : f32
      %55 = vector.broadcast %cst_37 : f32 to vector<128x1xf32>
      %56 = arith.addf %55, %54 : vector<128x1xf32>
      %cst_38 = arith.constant 1.000000e+00 : f32
      %57 = vector.broadcast %cst_38 : f32 to vector<128x1xf32>
      %58 = arith.divf %57, %56 : vector<128x1xf32>
      %cst_39 = arith.constant 1.000000e+00 : f32
      %59 = vector.broadcast %cst_39 : f32 to vector<128x1xf32>
      %60 = arith.subf %59, %58 : vector<128x1xf32>
      %61 = vector.broadcast %58 : vector<128x1xf32> to vector<128x128xf32>
      %62 = arith.mulf %61, %30 : vector<128x128xf32>
      %63 = vector.broadcast %60 : vector<128x1xf32> to vector<128x128xf32>
      %64 = arith.mulf %63, %43 : vector<128x128xf32>
      %65 = arith.addf %62, %64 : vector<128x128xf32>
      %66 = arith.truncf %65 : vector<128x128xf32> to vector<128x128xbf16>
      %c0_40 = arith.constant 0 : index
      %c0_41 = arith.constant 0 : index
      %67 = vector.load %arg9[%c0_40, %c0_41] : memref<128x128xbf16, #tpu.memory_space<vmem>>, vector<128x128xbf16>
      tpu.vector_store %arg9[%c0_40, %c0_41], %66 {strides = array<i32>} : memref<128x128xbf16, #tpu.memory_space<vmem>>, vector<128x128xbf16>,
    } else {
    }
    return
  }
  func.func @transform_0(%arg0: i32, %arg1: i32) -> (i32, i32) {
    %c0_i32 = arith.constant 0 : i32
    %c0_i32_0 = arith.constant 0 : i32
    return %arg1, %c0_i32 : i32, i32
  }
  func.func @transform_1(%arg0: i32, %arg1: i32) -> (i32, i32, i32) {
    %c0_i32 = arith.constant 0 : i32
    %c0_i32_0 = arith.constant 0 : i32
    return %c0_i32, %arg0, %arg1 : i32, i32, i32
  }
  func.func @transform_2(%arg0: i32, %arg1: i32) -> (i32, i32) {
    %c0_i32 = arith.constant 0 : i32
    %c0_i32_0 = arith.constant 0 : i32
    %c0_i32_1 = arith.constant 0 : i32
    return %c0_i32, %c0_i32_0 : i32, i32
  }
  func.func @transform_3(%arg0: i32, %arg1: i32) -> (i32, i32) {
    %c0_i32 = arith.constant 0 : i32
    %c0_i32_0 = arith.constant 0 : i32
    %c0_i32_1 = arith.constant 0 : i32
    return %c0_i32, %c0_i32_0 : i32, i32
  }
  func.func @transform_4(%arg0: i32, %arg1: i32) -> (i32, i32) {
    %c0_i32 = arith.constant 0 : i32
    %c0_i32_0 = arith.constant 0 : i32
    %c0_i32_1 = arith.constant 0 : i32
    return %c0_i32, %c0_i32_0 : i32, i32
  }
  func.func @transform_5(%arg0: i32, %arg1: i32) -> (i32, i32) {
    %c0_i32 = arith.constant 0 : i32
    %c0_i32_0 = arith.constant 0 : i32
    %c0_i32_1 = arith.constant 0 : i32
    return %c0_i32, %c0_i32_0 : i32, i32
  }
  func.func @transform_6(%arg0: i32, %arg1: i32) -> (i32, i32) {
    %c0_i32 = arith.constant 0 : i32
    %c0_i32_0 = arith.constant 0 : i32
    %c0_i32_1 = arith.constant 0 : i32
    return %c0_i32, %c0_i32_0 : i32, i32
  }
  func.func @transform_7(%arg0: i32, %arg1: i32) -> (i32, i32) {
    %c0_i32 = arith.constant 0 : i32
    %c0_i32_0 = arith.constant 0 : i32
    return %arg0, %c0_i32 : i32, i32
  }
}

</mosaic_0001>

<bundles_post_ra>
// kernel: tpu_custom_call.1
= control target key start
LH: loop header
LB: loop body
LE: loop exit
PB: predicated region body
PF: predicated region fallthrough
CT: control target
= control target key end

     0   :  { %s3668_s0 = inlined_call_operand.hbm [shape: bf16[256,128], index: 0, kind: input, shape index: {}]   ;;  %s3669_s1 = inlined_call_operand.hbm [shape: bf16[2,256,256], index: 1, kind: input, shape index: {}]   ;;  %s3670_s2 = inlined_call_operand.hbm [shape: bf16[128,256], index: 2, kind: input, shape index: {}]   ;;  %s3671_s3 = inlined_call_operand.vmem [shape: f32[1,256], index: 3, kind: input, shape index: {}]   ;;  %s3672_s4 = inlined_call_operand.hbm [shape: bf16[128,128], index: 4, kind: input, shape index: {}]   ;;  %s3673_s5 = inlined_call_operand.vmem [shape: f32[1,128], index: 5, kind: input, shape index: {}]   ;;  %s3674_s6 = inlined_call_operand.vmem [shape: f32[1,128], index: 6, kind: input, shape index: {}]   ;;  %s3675_s7 = inlined_call_operand.hbm [shape: bf16[256,128], index: 7, kind: output, shape index: {}]  }
   0x1   :  { %3692 = sst [smem:[#allocation32_spill]] %s3670_s2 }
   0x2   :  { %3693 = sst [smem:[#allocation33_spill]] %s3671_s3 }
   0x3   :  { %3694 = sst [smem:[#allocation34_spill]] %s3673_s5 }
   0x4   :  { %3695 = sst [smem:[#allocation35_spill]] %s3674_s6 }
   0x5   :  { %3696 = sst [smem:[#allocation36_spill]] %s3675_s7 }
   0x6   :  { %12 = vsyncpa [#allocation4], 0 }
   0x7   :  { %14 = vsyncpa [#allocation4 + $0x1], 0 }
   0x8   :  { %15 = vsyncpa [#allocation7], 0 }
   0x9   :  { %17 = vsyncpa [#allocation7 + $0x1], 0 }
   0xa   :  { %18 = vsyncpa [#allocation10], 0 }
   0xb   :  { %19 = vsyncpa [#allocation5], 0 }
   0xc   :  { %21 = vsyncpa [#allocation5 + $0x1], 0  ;;  %s3054_s24 = smov 0   ;;  %s3056_s25 = smov 0  }
   0xd   :  { %s3058_s26 = smov 0   ;;  %s3060_s27 = smov 0  }
   0xe   :  { %s3062_s28 = smov 0   ;;  %s3064_s29 = smov 0  }
   0xf   :  { %s3066_s30 = smov 0   ;;  %s3068_s8 = smov 0  }
  0x10   :  { %s3070_s9 = smov 0   ;;  %s3072_s10 = smov 0  }
  0x11   :  { %s3074_s11 = smov 0   ;;  %s3076_s12 = smov 0  }
  0x12   :  { %s3078_s13 = smov 0   ;;  %s3080_s14 = smov 0  }
  0x13 LB: > { %3697 = sst [smem:[#allocation20_spill]] %s2939_s24  ;;  %s3123_s15 = sadd.s32 4294967295, %s2991_s14   ;;  %s2991_s14 = sphi %s3080_s14, %s27_s14   ;;  %s2987_s13 = sphi %s3078_s13, %s3758_s13   ;;  %s2983_s12 = sphi %s3076_s12, %s3757_s12   ;;  %s2979_s11 = sphi %s3074_s11, %s3756_s11   ;;  %s2975_s10 = sphi %s3072_s10, %s3755_s10   ;;  %s2971_s9 = sphi %s3070_s9, %s3754_s9   ;;  %s2967_s8 = sphi %s3068_s8, %s3753_s8   ;;  %s2963_s30 = sphi %s3066_s30, %s3752_s30   ;;  %s2959_s29 = sphi %s3064_s29, %s3751_s29   ;;  %s2955_s28 = sphi %s3062_s28, %s3750_s28   ;;  %s2951_s27 = sphi %s3060_s27, %s3749_s27   ;;  %s2947_s26 = sphi %s3058_s26, %s3744_s26   ;;  %s2943_s25 = sphi %s3056_s25, %s3743_s25   ;;  %s2939_s24 = sphi %s3054_s24, %s3742_s24  }
  0x14   : > { %3698 = sst [smem:[#allocation21_spill]] %s2943_s25  ;;  %s36_s17 = sadd.s32 1, %s2983_s12 }
  0x15   : > { %3699 = sst [smem:[#allocation22_spill]] %s2947_s26  ;;  %s39_s18 = sadd.s32 1, %s2987_s13 }
  0x16   : > { %3700 = sst [smem:[#allocation23_spill]] %s2975_s10  ;;  %p37_p0 = scmp.ge.s32.totalorder %s36_s17, 2 }
  0x17   : > { %3701 = sst [smem:[#allocation24_spill]] %s2979_s11  ;;  %s46_s19 = sadd.s32 1, %s2971_s9 }
  0x18   : > { %p53_p1 = scmp.ne.s32.totalorder %s2971_s9, %s2967_s8  ;;  %p54_p2 = scmp.eq.s32.totalorder %s2991_s14, 0 }
  0x19   : > { %s3760_s17 = smov (%p37_p0, %s36_s17), 0  ;;  %s3762_s18 = smov (!%p37_p0, %s39_s18), %s2987_s13 }
  0x1a   : > { %3702 = sst [smem:[#allocation25_spill]] %s3760_s17  ;;  %s43_s20 = ssub.s32 %s2983_s12, %s3760_s17 }
  0x1b   : > { %p3139_p3 = por %p54_p2, %p53_p1  ;;  %p41_p4 = scmp.ge.s32.totalorder %s3762_s18, 2 }
  0x1c   : > { %p44_p5 = scmp.eq.s32.totalorder %s43_s20, 0  ;;  %p59_p6 = scmp.ne.s32.totalorder %s2967_s8, %s2963_s30 }
  0x1d   : > { %p3686_p7 = scmp.eq.s32.totalorder %s3123_s15, 0  ;;  %s3764_s18 = smov (%p41_p4, %s3762_s18), 0 }
  0x1e   : > { %3704 = sst [smem:[#allocation26_spill]] %s3764_s18  ;;  %s69_s16 = ssub.s32 %s2987_s13, %s3764_s18 }
  0x1f   : > { %s3148_s22 = scalar_select %p44_p5, %s2971_s9, %s46_s19  }
  0x20   : > { %p3152_p8 = por %p3686_p7, %p59_p6  ;;  %s71_s30 = sor.u32 %s69_s16, %s43_s20 }
  0x21   : > { %3705 = sst [smem:[#allocation27_spill]] %s3148_s22  ;;  %s74_s17 = sadd.s32 1, %s2959_s29 }
  0x22   : > { %s3706_s23 = scalar_select %p3152_p8, 1, 0 }
  0x23   : > { %p72_p9 = scmp.eq.s32.totalorder %s71_s30, 0  ;;  %p81_p10 = scmp.ne.s32.totalorder %s2959_s29, %s2955_s28 }
  0x24   : > { %p87_p11 = scmp.ne.s32.totalorder %s2955_s28, %s2951_s27  ;;  %p203_p12 = scmp.eq.s32.totalorder %s69_s16, 0 }
  0x25   : > { %s3164_s7 = scalar_select %p72_p9, %s2959_s29, %s74_s17  }
  0x26   : > { %p3168_p13 = por %p81_p10, %p54_p2  ;;  %p3174_p0 = por %p87_p11, %p3686_p7 }
  0x27   : > { %3707 = sst [smem:[#allocation28_spill]] %s3164_s7  ;;  %s205_s20 = sadd.s32 1, %s2947_s26 }
  0x28   : > { %s3709_s22 = scalar_select %p3174_p0, 1, 0 }
  0x29   : > { %p215_p1 = scmp.ne.s32.totalorder %s2947_s26, %s2943_s25  ;;  %p216_p4 = scmp.eq.s32.totalorder %s3123_s15, 3 }
  0x2a   : > { %s3182_s18 = scalar_select %p203_p12, %s2947_s26, %s205_s20  }
  0x2b   : > { %p221_p5 = scmp.ne.s32.totalorder %s2943_s25, %s2939_s24  ;;  %s3711_s27 = sadd.s32 4294967294, %s2991_s14  }
  0x2c   : > { %3710 = sst [smem:[#allocation29_spill]] %s3182_s18  ;;  %p222_p6 = scmp.eq.s32.totalorder %s3711_s27, 3 }
  0x2d   : > { %p2037_p9 = scmp.ge.s32.totalorder %s2991_s14, 1  ;;  %p3190_p8 = por %p216_p4, %p215_p1 }
  0x2e   : > { %p229_p2 = scmp.lt.s32.totalorder %s2991_s14, 5  ;;  %p3195_p10 = por %p222_p6, %p221_p5 }
  0x2f   : > { %s3712_s16 = scalar_select %p3190_p8, 1, 0 }
  0x30   : > { %s3714_s17 = scalar_select %p3195_p10, 1, 0 }
  0x31   : > { %3713 = sst [smem:[#allocation30_spill]] %s3712_s16  ;;  %p3199_p11 = pnand %p2037_p9, %p229_p2 }
  0x32   : > { %3715 = sst [smem:[#allocation31_spill]] %s3714_s17  ;;  %s2993_s20 = smov [#allocation8]  }
  0x33   : > { %s3716_s30 = scalar_select %p3199_p11, 1, 0 }
  0x34   : > { %s241_s7 = sshll.u32 %s2993_s20, 4  ;;  %p2426_p12 = pneg %p3199_p11  ;;  %s242_s7 = int_to_ptr.vmem [resolvable:$true] %s241_s7 }
  0x35   : > { %s2994_s18 = smov [#allocation9]   ;;  %s2768_s17 = scalar_lea.vmem %s242_s7, 2048 }
  0x36   : > { %p3207_p1 = pnand %p2426_p12, %p3686_p7  ;;  %s257_s26 = sshll.u32 %s2994_s18, 4  ;;  %s258_s26 = int_to_ptr.vmem [resolvable:$true] %s257_s26 }
  0x37   : > { %p2769_p5 = scmp.ne.s32.totalorder %s242_s7, %s2768_s17  ;;  %p2776_p2 = scmp.lt.s32.totalorder %s242_s7, %s242_s7 }
  0x38   : > { %p2759_p4 = pneg %p3207_p1  ;;  %p2777_p10 = scmp.lt.s32.totalorder %s2768_s17, %s2768_s17 }
  0x3a   : > { %p2771_p6 = pnand %p2769_p5, %p2759_p4  ;;  %p2778_p8 = por %p2777_p10, %p2776_p2 }
  0x3c   : > { %p2772_p9 = pneg %p2771_p6 }
  0x3e   : > { %p2779_p12 = pnand %p2778_p8, %p2772_p9 }
  0x40   : > { %2782 = shalt.err (!%p2779_p12)
}
  0x41   : > { %s2995_s20 = smov 128   ;;  %s2996_s24 = smov 8  }
  0x42   : > { %s3718_s2 = sld [smem:[#allocation32_spill]]  ;;  %s2794_s11 = scalar_lea.vmem %s258_s26, 1024 }
  0x43   : > { %p2795_p7 = scmp.ne.s32.totalorder %s258_s26, %s2794_s11  ;;  %p2802_p0 = scmp.lt.s32.totalorder %s258_s26, %s258_s26 }
  0x44   : > { %p2803_p11 = scmp.lt.s32.totalorder %s2794_s11, %s2794_s11 }
  0x45   : > { %p2797_p5 = pnand %p2795_p7, %p2759_p4 }
  0x46   : > { %p2804_p10 = por %p2803_p11, %p2802_p0 }
  0x47   : > { %p2798_p6 = pneg %p2797_p5 }
  0x48   : > { %2429 = dma.hbm_to_vmem [thread:$0]  (!%p3207_p1), %s3718_s2, 2048, %s242_s7, [#allocation7], %s2995_s20, %s2995_s20, %s2996_s24  }
  0x49   : > { %p2805_p8 = pnand %p2804_p10, %p2798_p6 }
  0x4b   : > { %2808 = shalt.err (!%p2805_p8)
}
  0x4c   : > { %s2997_s17 = smov 64   ;;  %s2998_s6 = smov 4  }
  0x4d   : > { %2432 = dma.hbm_to_vmem [thread:$0]  (!%p3207_p1), %s3672_s4, 1024, %s258_s26, [#allocation10], %s2997_s17, %s2997_s17, %s2998_s6  }
  0x4e   : > { %p2040_p9 = scmp.ge.s32.totalorder %s2991_s14, 4 }
  0x4f   : > { %s277_s7 = sand.u32 (!%p2040_p9), 1, %s2971_s9   ;;  %s2147_s24 = sshll.u32 (!%p2040_p9), %s2983_s12, 10 }
  0x50   : > { %273 = sbr.rel (%p2040_p9) target bundleno = 111 (0x6f), region = 36  ;;  %s2041_s11 = sshll.u32 (!%p2040_p9), %s277_s7, 6 }
  0x51   : > { %s287_s18 = scalar_lea.hbm (!%p2040_p9), %s3668_s0, %s2147_s24  ;;  %s281_s2 = scalar_lea.vmem (!%p2040_p9), [#allocation3], %s2041_s11 }
  0x52   : > { %s288_s10 = sshll.u32 (!%p2040_p9), %s281_s2, 4  ;;  %s278_s27 = scalar_lea.sflag (!%p2040_p9), [#allocation4], %s277_s7  ;;  %s289_s10 = int_to_ptr.vmem [resolvable:$true] %s288_s10 }
  0x53   : > { %s2821_s25 = scalar_lea.vmem (!%p2040_p9), %s289_s10, 1024  ;;  %s2999_s3 = smov (!%p2040_p9), [#allocation3]  }
  0x54   : > { %p2822_p7 = scmp.ne.s32.totalorder (!%p2040_p9), %s289_s10, %s2821_s25  ;;  %s2825_s5 = sshll.u32 (!%p2040_p9), %s2999_s3, 4  ;;  %s2826_s5 = int_to_ptr.vmem [resolvable:$false] %s2825_s5 }
  0x55   : > { %s2827_s6 = scalar_lea.vmem %s2826_s5, 2048  ;;  %p2828_p1 = scmp.lt.s32.totalorder %s289_s10, %s2826_s5 }
  0x56   : > { %p2823_p0 = pnand %p2822_p7, %p3139_p3  ;;  %p2829_p4 = scmp.lt.s32.totalorder %s2827_s6, %s2821_s25 }
  0x58   : > { %p2824_p11 = pneg %p2823_p0  ;;  %p2830_p2 = por %p2829_p4, %p2828_p1 }
  0x5a   : > { %p2831_p12 = pnand %p2830_p2, %p2824_p11 }
  0x5c   : > { %2834 = shalt.err (!%p2831_p12)
}
  0x5d   : > { %s3000_s26 = smov 64   ;;  %s3001_s17 = smov 4  }
  0x5e   : > { %2409 = dma.hbm_to_vmem [thread:$0]  (%p3139_p3), %s287_s18, 1024, %s289_s10, %s278_s27, %s3000_s26, %s3000_s26, %s3001_s17  }
  0x5f   : > { %s300_s2 = sand.u32 1, %s2959_s29   ;;  %s298_s7 = sand.u32 1, %s2991_s14  }
  0x60   : > { %s2044_s24 = sshll.u32 %s300_s2, 7  ;;  %s2148_s25 = sshll.u32 %s2987_s13, 5 }
  0x61   : > { %s308_s11 = sadd.s32 %s2983_s12, %s2148_s25  ;;  %s302_s16 = scalar_lea.vmem [#allocation6], %s2044_s24 }
  0x62   : > { %s323_s20 = sshll.u32 %s302_s16, 4  ;;  %s2047_s3 = sshll.u32 %s308_s11, 6  ;;  %s324_s20 = int_to_ptr.vmem [resolvable:$true] %s323_s20 }
  0x63   : > { %s2410_s10 = scalar_select %p3168_p13, [#allocation0], [#allocation14] }
  0x64   : > { %s3002_s21 = smov 4096   ;;  %s3003_s27 = smov 1024  }
  0x65   : > { %2411 = sst [smem:[#allocation13]] (%p3168_p13), %s3002_s21  ;;  %s3004_s5 = smov 16  }
  0x66   : > { %s315_s18 = sld [smem:[%s2410_s10]]   ;;  %s3005_s6 = smov 128  }
  0x67   : > { %2412 = sst [smem:[#allocation13 + $0x1]] (%p3168_p13), %s3003_s27  ;;  %s310_s2 = scalar_lea.hbm %s3669_s1, %s2047_s3 }
  0x68   : > { %2413 = sst [smem:[#allocation13 + $0x2]] (%p3168_p13), %s3004_s5  ;;  %s3006_s24 = smov 64  }
  0x69   : > { %2414 = sst [smem:[#allocation13 + $0x3]] (%p3168_p13), %s3005_s6  ;;  %s3007_s25 = smov 4  }
  0x6a   : > { %2415 = sst [smem:[#allocation13 + $0x4]] (%p3168_p13), %s3006_s24  ;;  %s299_s10 = scalar_lea.sflag [#allocation7], %s298_s7 }
  0x6b   : > { %2416 = sst [smem:[#allocation13 + $0x5]] (%p3168_p13), %s3007_s25  ;;  %s3008_s21 = smov 131072  }
  0x6c   : > { %s2048_s11 = sshll.u32 %s315_s18, 26 }
  0x6d   : > { %s2049_s16 = sadd.s32 134217728, %s2048_s11 }
  0x6e   : > { %2417 = dma.general (%p3168_p13), %s310_s2, 2048, %s324_s20, %s299_s10, %s3008_s21, [#allocation13], %s2049_s16, 0  }
  0x6f PF: > { %p3719_p3 = scmp.ne.s32.totalorder %s3716_s30, 0 }
  0x70   : > { %s350_s27 = sand.u32 (!%p3719_p3), 1, %s2967_s8   ;;  %p3720_p5 = scmp.ne.s32.totalorder (!%p3719_p3), %s3706_s23, 0 }
  0x71   : > { %348 = sbr.rel (%p3719_p3) target bundleno = 1254 (0x4e6), region = 48  ;;  %s2051_s3 = sshll.u32 (!%p3719_p3), %s350_s27, 6 }
  0x72   : > { %s351_s5 = scalar_lea.sflag (!%p3719_p3), [#allocation4], %s350_s27  ;;  %s3265_s6 = scalar_lea.vmem (!%p3719_p3), [#allocation3], %s2051_s3 }
  0x76   : > { %2918 = dma.done.wait (%p3720_p5), %s351_s5, 1024  }
  0x77   : > { %2920 = vsyncadd (%p3720_p5), %s351_s5, 4294966272  ;;  %s359_s19 = sand.u32 1, %s3123_s15   ;;  %s361_s7 = sand.u32 1, %s2955_s28  }
  0x78   : > { %s2052_s20 = sshll.u32 %s361_s7, 7  ;;  %s360_s30 = scalar_lea.sflag [#allocation7], %s359_s19 }
  0x79   : > { %s3273_s18 = scalar_lea.vmem [#allocation6], %s2052_s20  ;;  %p3721_p13 = scmp.ne.s32.totalorder %s3709_s22, 0 }
  0x7b   : > { %2922 = dma.done.wait (%p3721_p13), %s360_s30, 2048  }
  0x7c   : > { %2924 = vsyncadd (%p3721_p13), %s360_s30, 4294965248  ;;  %p3722_p6 = scmp.eq.s32.totalorder %s3123_s15, 0 }
  0x7e   : > { %2926 = dma.done.wait (%p3722_p6), [#allocation7], 2048   ;;  %p3723_p10 = pmov %p3722_p6 }
  0x7f   : > { %p3724_p8 = pmov %p3722_p6 }
  0x80   : > { %2928 = vsyncadd (%p3723_p10), [#allocation7], 4294965248 }
  0x81   : > { %2930 = dma.done.wait (%p3724_p8), [#allocation10], 1024   ;;  %p3725_p9 = pmov %p3722_p6 }
  0x82   : > { %s3726_s23 = sld [smem:[#allocation21_spill]] }
  0x83   : > { %2932 = vsyncadd (%p3725_p9), [#allocation10], 4294966272  ;;  %s3727_s22 = sld [smem:[#allocation23_spill]] }
  0x88   : > { %s404_s26 = sand.u32 1, %s3726_s23  }
  0x89   : > { %s2055_s17 = sshll.u32 %s404_s26, 6  ;;  %p2056_p7 = scmp.ne.s32.totalorder %s3727_s22, 0 }
  0x8a   : > { %s3290_s2 = scalar_lea.vmem [#allocation11], %s2055_s17 }
  0x8b   : > { %414 = sbr.rel (%p2056_p7) target bundleno = 161 (0xa1), region = 68 }
  0x90   : > { %v3009_v0 = vmov 0.0  }
  0x91   : > { %415 = vst [vmem:[#allocation2 + $0xb0] sm:$0xff] %v3009_v0  ;;  %416 = vst [vmem:[#allocation2] sm:$0xff] %v3009_v0 }
  0x92   : > { %417 = vst [vmem:[#allocation2 + $0xd8] sm:$0xff] %v3009_v0  ;;  %418 = vst [vmem:[#allocation2 + $0x18] sm:$0xff] %v3009_v0 }
  0x93   : > { %419 = vst [vmem:[#allocation2 + $0x50] sm:$0xff] %v3009_v0  ;;  %420 = vst [vmem:[#allocation2 + $0x68] sm:$0xff] %v3009_v0 }
  0x94   : > { %421 = vst [vmem:[#allocation2 + $0x30] sm:$0xff] %v3009_v0  ;;  %422 = vst [vmem:[#allocation2 + $0x48] sm:$0xff] %v3009_v0 }
  0x95   : > { %423 = vst [vmem:[#allocation2 + $0x80] sm:$0xff] %v3009_v0  ;;  %424 = vst [vmem:[#allocation2 + $0x88] sm:$0xff] %v3009_v0 }
  0x96   : > { %425 = vst [vmem:[#allocation2 + $0xe8] sm:$0xff] %v3009_v0  ;;  %426 = vst [vmem:[#allocation2 + $0xb8] sm:$0xff] %v3009_v0 }
  0x97   : > { %427 = vst [vmem:[#allocation2 + $0x60] sm:$0xff] %v3009_v0  ;;  %428 = vst [vmem:[#allocation2 + $0xf0] sm:$0xff] %v3009_v0 }
  0x98   : > { %429 = vst [vmem:[#allocation2 + $0x8] sm:$0xff] %v3009_v0  ;;  %430 = vst [vmem:[#allocation2 + $0x78] sm:$0xff] %v3009_v0 }
  0x99   : > { %431 = vst [vmem:[#allocation2 + $0x38] sm:$0xff] %v3009_v0  ;;  %432 = vst [vmem:[#allocation2 + $0x58] sm:$0xff] %v3009_v0 }
  0x9a   : > { %433 = vst [vmem:[#allocation2 + $0x40] sm:$0xff] %v3009_v0  ;;  %434 = vst [vmem:[#allocation2 + $0xc8] sm:$0xff] %v3009_v0 }
  0x9b   : > { %435 = vst [vmem:[#allocation2 + $0xe0] sm:$0xff] %v3009_v0  ;;  %436 = vst [vmem:[#allocation2 + $0x90] sm:$0xff] %v3009_v0 }
  0x9c   : > { %437 = vst [vmem:[#allocation2 + $0x70] sm:$0xff] %v3009_v0  ;;  %438 = vst [vmem:[#allocation2 + $0xc0] sm:$0xff] %v3009_v0 }
  0x9d   : > { %439 = vst [vmem:[#allocation2 + $0xa8] sm:$0xff] %v3009_v0  ;;  %440 = vst [vmem:[#allocation2 + $0xd0] sm:$0xff] %v3009_v0 }
  0x9e   : > { %441 = vst [vmem:[#allocation2 + $0x10] sm:$0xff] %v3009_v0  ;;  %442 = vst [vmem:[#allocation2 + $0x28] sm:$0xff] %v3009_v0 }
  0x9f   : > { %443 = vst [vmem:[#allocation2 + $0xa0] sm:$0xff] %v3009_v0  ;;  %444 = vst [vmem:[#allocation2 + $0xf8] sm:$0xff] %v3009_v0 }
  0xa0   : > { %445 = vst [vmem:[#allocation2 + $0x20] sm:$0xff] %v3009_v0  ;;  %446 = vst [vmem:[#allocation2 + $0x98] sm:$0xff] %v3009_v0 }
  0xa1 PF: > { %v2573_v1 = vld [vmem:[#allocation8 + $0x74] ss:$8 sps:$4 sm:$0xff]   ;;  %v2575_v2 = vld [vmem:[#allocation8 + $0x70] ss:$8 sps:$4 sm:$0xff]   ;;  %v3010_v3 = vmov 0   ;;  %v2597_v18 = vld [vmem:[%s3265_s6] sm:$0xff]  }
  0xa2   : > { %639 = vmatprep.mubr.bf16.mxu0 %v3010_v3  ;;  %607 = vmatprep.subr.bf16.mxu0 %v2573_v1  ;;  %v2576_v4 = vld [vmem:[#allocation8 + $0x64] ss:$8 sps:$4 sm:$0xff]   ;;  %v2578_v5 = vld [vmem:[#allocation8 + $0x60] ss:$8 sps:$4 sm:$0xff]   ;;  %v2579_v6 = vld [vmem:[#allocation8 + $0x54] ss:$8 sps:$4 sm:$0xff]  }
  0xa3   : > { %608 = vmatpush1.bf16.msra.mxu0 %v2575_v2  ;;  %v2581_v7 = vld [vmem:[#allocation8 + $0x50] ss:$8 sps:$4 sm:$0xff]   ;;  %v2582_v8 = vld [vmem:[#allocation8 + $0x44] ss:$8 sps:$4 sm:$0xff]   ;;  %v2584_v9 = vld [vmem:[#allocation8 + $0x40] ss:$8 sps:$4 sm:$0xff]  }
  0xa4   : > { %609 = vmatprep.subr.bf16.mxu0 %v2576_v4  ;;  %v2585_v10 = vld [vmem:[#allocation8 + $0x34] ss:$8 sps:$4 sm:$0xff]   ;;  %v2587_v11 = vld [vmem:[#allocation8 + $0x30] ss:$8 sps:$4 sm:$0xff]   ;;  %v2588_v12 = vld [vmem:[#allocation8 + $0x24] ss:$8 sps:$4 sm:$0xff]  }
  0xa5   : > { %v2590_v13 = vld [vmem:[#allocation8 + $0x20] ss:$8 sps:$4 sm:$0xff]   ;;  %v2591_v14 = vld [vmem:[#allocation8 + $0x14] ss:$8 sps:$4 sm:$0xff]   ;;  %v2593_v15 = vld [vmem:[#allocation8 + $0x10] ss:$8 sps:$4 sm:$0xff]  }
  0xa6   : > { %v2594_v16 = vld [vmem:[#allocation8 + $0x4] ss:$8 sps:$4 sm:$0xff]   ;;  %v2596_v17 = vld [vmem:[#allocation8] ss:$8 sps:$4 sm:$0xff]   ;;  %v2599_v20 = vld [vmem:[%s3265_s6 + $0x10] sm:$0xff]   ;;  %s3728_s15 = sld [smem:[#allocation23_spill]] }
  0xa7   : > { %610 = vmatpush1.bf16.msra.mxu0 %v2578_v5  ;;  %v2598_v19 = vld [vmem:[%s3265_s6 + $0x8] sm:$0xff]   ;;  %v2600_v21 = vld [vmem:[%s3265_s6 + $0x18] sm:$0xff]   ;;  %v2601_v22 = vld [vmem:[%s3265_s6 + $0x20] sm:$0xff]  }
  0xa8   : > { %611 = vmatprep.subr.bf16.mxu0 %v2579_v6  ;;  %v2602_v23 = vld [vmem:[%s3265_s6 + $0x28] sm:$0xff]   ;;  %v2603_v24 = vld [vmem:[%s3265_s6 + $0x30] sm:$0xff]   ;;  %v2604_v25 = vld [vmem:[%s3265_s6 + $0x38] sm:$0xff]  }
  0xa9   : > { %v2605_v26 = vld [vmem:[%s3273_s18] sm:$0xff]  }
  0xaa   : > { %2293 = vmatprep.mubr.bf16.mxu1 %v2605_v26  ;;  %v738_v26 = vld [vmem:[#allocation2 + $0x50] sm:$0xff] }
  0xab   : > { %612 = vmatpush1.bf16.msra.mxu0 %v2581_v7 }
  0xac   : > { %613 = vmatprep.subr.bf16.mxu0 %v2582_v8  ;;  %p2113_p0 = scmp.ne.s32.totalorder %s3728_s15, 1 }
  0xad   : > { %s3729_s11 = sld [smem:[#allocation33_spill]] (!%p2113_p0) }
  0xae   : > { %s3731_s5 = sld [smem:[#allocation34_spill]] (!%p2113_p0) }
  0xaf   : > { %614 = vmatpush1.bf16.msra.mxu0 %v2584_v9  ;;  %v2606_v9 = vld [vmem:[%s3273_s18 + $0x8] sm:$0xff]   ;;  %s3732_s7 = sld [smem:[#allocation35_spill]] (!%p2113_p0) }
  0xb0   : > { %615 = vmatprep.subr.bf16.mxu0 %v2585_v10  ;;  %v2607_v10 = vld [vmem:[%s3273_s18 + $0x10] sm:$0xff]  }
  0xb3   : > { %616 = vmatpush1.bf16.msra.mxu0 %v2587_v11  ;;  %s3730_s16 = smov (!%p2113_p0), %s3729_s11 }
  0xb4   : > { %617 = vmatprep.subr.bf16.mxu0 %v2588_v12 }
  0xb7   : > { %618 = vmatpush1.bf16.msra.mxu0 %v2590_v13  ;;  %v2608_v13 = vld [vmem:[%s3273_s18 + $0x18] sm:$0xff]  }
  0xb8   : > { %619 = vmatprep.subr.bf16.mxu0 %v2591_v14  ;;  %v2609_v14 = vld [vmem:[%s3273_s18 + $0x20] sm:$0xff]  }
  0xbb   : > { %620 = vmatpush1.bf16.msra.mxu0 %v2593_v15  ;;  %v2610_v15 = vld [vmem:[%s3273_s18 + $0x28] sm:$0xff]  }
  0xbc   : > { %621 = vmatprep.subr.bf16.mxu0 %v2594_v16  ;;  %v2611_v16 = vld [vmem:[%s3273_s18 + $0x30] sm:$0xff]  }
  0xbf   : > { %622 = vmatpush1.bf16.msra.mxu0 %v2596_v17  ;;  %v2612_v17 = vld [vmem:[%s3273_s18 + $0x38] sm:$0xff]  }
  0xc2   : > { %640 = vmatmul.mubr.bf16.vlgmr.msra.gmra.mxu0 %v2597_v18  ;;  %v2613_v18 = vld [vmem:[%s3273_s18 + $0x40] sm:$0xff]  }
  0xc3   : > { %649 = vmatprep.mubr.bf16.mxu0 %v3010_v3 }
  0xca   : > { %650 = vmatmul.mubr.bf16.gmra.mxu0 %v2598_v19  ;;  %v2614_v19 = vld [vmem:[%s3273_s18 + $0x48] sm:$0xff]  }
  0xcb   : > { %659 = vmatprep.mubr.bf16.mxu0 %v3010_v3 }
  0xd2   : > { %660 = vmatmul.mubr.bf16.gmra.mxu0 %v2599_v20  ;;  %v2615_v20 = vld [vmem:[%s3273_s18 + $0x50] sm:$0xff]  }
  0xd3   : > { %669 = vmatprep.mubr.bf16.mxu0 %v3010_v3 }
  0xda   : > { %670 = vmatmul.mubr.bf16.gmra.mxu0 %v2600_v21  ;;  %v2616_v21 = vld [vmem:[%s3273_s18 + $0x58] sm:$0xff]  }
  0xdb   : > { %679 = vmatprep.mubr.bf16.mxu0 %v3010_v3 }
  0xe2   : > { %680 = vmatmul.mubr.bf16.gmra.mxu0 %v2601_v22  ;;  %v2617_v22 = vld [vmem:[%s3273_s18 + $0x60] sm:$0xff]  }
  0xe3   : > { %689 = vmatprep.mubr.bf16.mxu0 %v3010_v3 }
  0xea   : > { %690 = vmatmul.mubr.bf16.gmra.mxu0 %v2602_v23  ;;  %v2618_v23 = vld [vmem:[%s3273_s18 + $0x68] sm:$0xff]  }
  0xeb   : > { %699 = vmatprep.mubr.bf16.mxu0 %v3010_v3 }
  0xf2   : > { %700 = vmatmul.mubr.bf16.gmra.mxu0 %v2603_v24  ;;  %v2619_v24 = vld [vmem:[%s3273_s18 + $0x70] sm:$0xff]  }
  0xf3   : > { %709 = vmatprep.mubr.bf16.mxu0 %v3010_v3 }
  0xfa   : > { %710 = vmatmul.mubr.bf16.gmra.mxu0 %v2604_v25  ;;  %v2620_v25 = vld [vmem:[%s3273_s18 + $0x78] sm:$0xff]  }
 0x182   : > { %v641_v27 = vpop.f32.mrf.mxu0 }
 0x184   : > { %v643_v28 = vpop.f32.mrf.mxu0 }
 0x186   : > { %v645_v29 = vpop.f32.mrf.mxu0 }
 0x187   : > { %v720_v30 = vpack.c.bf16 %v645_v29, %v641_v27 }
 0x188   : > { %v647_v31 = vpop.f32.mrf.mxu0 }
 0x189   : > { %v3302_v32 = vpack.c.bf16 %v647_v31, %v643_v28  ;;  %v736_v28 = vld [vmem:[#allocation2 + $0xb0] sm:$0xff] }
 0x18a   : > { %v651_v33 = vpop.f32.mrf.mxu0  ;;  %v739_v31 = vld [vmem:[#allocation2 + $0x30] sm:$0xff] }
 0x18c   : > { %v653_v34 = vpop.f32.mrf.mxu0 }
 0x18e   : > { %v655_v35 = vpop.f32.mrf.mxu0 }
 0x18f   : > { %v722_v36 = vpack.c.bf16 %v655_v35, %v651_v33 }
 0x190   : > { %v657_v37 = vpop.f32.mrf.mxu0 }
 0x191   : > { %v3304_v38 = vpack.c.bf16 %v657_v37, %v653_v34  ;;  %v737_v34 = vld [vmem:[#allocation2 + $0xd8] sm:$0xff]  ;;  %v742_v37 = vld [vmem:[#allocation2 + $0x60] sm:$0xff] }
 0x192   : > { %v661_v39 = vpop.f32.mrf.mxu0 }
 0x194   : > { %v663_v40 = vpop.f32.mrf.mxu0 }
 0x196   : > { %v665_v41 = vpop.f32.mrf.mxu0 }
 0x197   : > { %v724_v6 = vpack.c.bf16 %v665_v41, %v661_v39 }
 0x198   : > { %v667_v42 = vpop.f32.mrf.mxu0 }
 0x199   : > { %v3306_v43 = vpack.c.bf16 %v667_v42, %v663_v40  ;;  %v740_v40 = vld [vmem:[#allocation2 + $0x80] sm:$0xff] }
 0x19a   : > { %v671_v44 = vpop.f32.mrf.mxu0 }
 0x19c   : > { %v673_v45 = vpop.f32.mrf.mxu0 }
 0x19e   : > { %v675_v46 = vpop.f32.mrf.mxu0 }
 0x19f   : > { %v726_v5 = vpack.c.bf16 %v675_v46, %v671_v44  ;;  %v741_v46 = vld [vmem:[#allocation2 + $0xe8] sm:$0xff] }
 0x1a0   : > { %v677_v47 = vpop.f32.mrf.mxu0 }
 0x1a1   : > { %v727_v48 = vpack.c.bf16 %v677_v47, %v673_v45 }
 0x1a2   : > { %v681_v49 = vpop.f32.mrf.mxu0 }
 0x1a4   : > { %v683_v50 = vpop.f32.mrf.mxu0 }
 0x1a6   : > { %v685_v51 = vpop.f32.mrf.mxu0 }
 0x1a7   : > { %v728_v4 = vpack.c.bf16 %v685_v51, %v681_v49  ;;  %v746_v49 = vld [vmem:[#allocation2 + $0xe0] sm:$0xff] }
 0x1a8   : > { %v687_v52 = vpop.f32.mrf.mxu0 }
 0x1a9   : > { %v729_v53 = vpack.c.bf16 %v687_v52, %v683_v50  ;;  %v744_v52 = vld [vmem:[#allocation2 + $0x38] sm:$0xff] }
 0x1aa   : > { %v691_v54 = vpop.f32.mrf.mxu0 }
 0x1ac   : > { %v693_v55 = vpop.f32.mrf.mxu0 }
 0x1ae   : > { %v695_v56 = vpop.f32.mrf.mxu0 }
 0x1af   : > { %v730_v3 = vpack.c.bf16 %v695_v56, %v691_v54 }
 0x1b0   : > { %v697_v57 = vpop.f32.mrf.mxu0 }
 0x1b1   : > { %v731_v12 = vpack.c.bf16 %v697_v57, %v693_v55  ;;  %v747_v55 = vld [vmem:[#allocation2 + $0x70] sm:$0xff] }
 0x1b2   : > { %v701_v58 = vpop.f32.mrf.mxu0 }
 0x1b4   : > { %v703_v59 = vpop.f32.mrf.mxu0 }
 0x1b6   : > { %v705_v60 = vpop.f32.mrf.mxu0 }
 0x1b7   : > { %v732_v2 = vpack.c.bf16 %v705_v60, %v701_v58  ;;  %v745_v58 = vld [vmem:[#allocation2 + $0x40] sm:$0xff] }
 0x1b8   : > { %v707_v61 = vpop.f32.mrf.mxu0 }
 0x1b9   : > { %v733_v11 = vpack.c.bf16 %v707_v61, %v703_v59  ;;  %v750_v61 = vld [vmem:[#allocation2 + $0xa0] sm:$0xff] }
 0x1ba   : > { %v711_v62 = vpop.f32.mrf.mxu0 }
 0x1bc   : > { %v713_v63 = vpop.f32.mrf.mxu0 }
 0x1be   : > { %v715_v0 = vpop.f32.mrf.mxu0 }
 0x1bf   : > { %v734_v1 = vpack.c.bf16 %v715_v0, %v711_v62  ;;  %v748_v0 = vld [vmem:[#allocation2 + $0xa8] sm:$0xff] }
 0x1c0   : > { %v717_v7 = vpop.f32.mrf.mxu0 }
 0x1c1   : > { %2277 = vmatprep.subr.bf16.mxu1 %v734_v1  ;;  %v735_v8 = vpack.c.bf16 %v717_v7, %v713_v63 }
 0x1c2   : > { %2278 = vmatpush3.bf16.msra.mxu1 %v734_v1 }
 0x1c3   : > { %2279 = vmatprep.subr.bf16.mxu1 %v732_v2 }
 0x1c6   : > { %2280 = vmatpush3.bf16.msra.mxu1 %v732_v2 }
 0x1c7   : > { %2281 = vmatprep.subr.bf16.mxu1 %v730_v3 }
 0x1ca   : > { %2282 = vmatpush3.bf16.msra.mxu1 %v730_v3  ;;  %v751_v3 = vld [vmem:[#allocation2 + $0x20] sm:$0xff] }
 0x1cb   : > { %2283 = vmatprep.subr.bf16.mxu1 %v728_v4 }
 0x1ce   : > { %2284 = vmatpush3.bf16.msra.mxu1 %v728_v4 }
 0x1cf   : > { %2285 = vmatprep.subr.bf16.mxu1 %v726_v5 }
 0x1d2   : > { %2286 = vmatpush3.bf16.msra.mxu1 %v726_v5 }
 0x1d3   : > { %2287 = vmatprep.subr.bf16.mxu1 %v724_v6 }
 0x1d6   : > { %2288 = vmatpush3.bf16.msra.mxu1 %v724_v6  ;;  %v749_v6 = vld [vmem:[#allocation2 + $0x10] sm:$0xff] }
 0x1d7   : > { %2289 = vmatprep.subr.bf16.mxu1 %v722_v36 }
 0x1da   : > { %2290 = vmatpush3.bf16.msra.mxu1 %v722_v36 }
 0x1db   : > { %2291 = vmatprep.subr.bf16.mxu1 %v720_v30 }
 0x1de   : > { %2292 = vmatpush3.bf16.msra.mxu1 %v720_v30 }
 0x1df   : > { %2309 = vmatprep.subr.bf16.mxu1 %v735_v8 }
 0x1e1   : > { %2294 = vmatmul.mubr.bf16.vlgmr.msra.gmra.mxu1 %v2606_v9  ;;  %v947_v9 = vld [vmem:[#allocation2 + $0x68] sm:$0xff] }
 0x1e2   : > { %2310 = vmatpush3.bf16.msra.mxu1 %v735_v8  ;;  %2297 = vmatprep.mubr.bf16.mxu1 %v2607_v10 }
 0x1e3   : > { %2311 = vmatprep.subr.bf16.mxu1 %v733_v11 }
 0x1e6   : > { %2312 = vmatpush3.bf16.msra.mxu1 %v733_v11 }
 0x1e7   : > { %2313 = vmatprep.subr.bf16.mxu1 %v731_v12 }
 0x1e9   : > { %2298 = vmatmul.mubr.bf16.gmra.mxu1 %v2608_v13 }
 0x1ea   : > { %2314 = vmatpush3.bf16.msra.mxu1 %v731_v12  ;;  %2301 = vmatprep.mubr.bf16.mxu1 %v2609_v14  ;;  %v945_v12 = vld [vmem:[#allocation2] sm:$0xff] }
 0x1eb   : > { %2315 = vmatprep.subr.bf16.mxu1 %v729_v53 }
 0x1ee   : > { %2316 = vmatpush3.bf16.msra.mxu1 %v729_v53 }
 0x1ef   : > { %2317 = vmatprep.subr.bf16.mxu1 %v727_v48 }
 0x1f1   : > { %2302 = vmatmul.mubr.bf16.gmra.mxu1 %v2610_v15  ;;  %v948_v15 = vld [vmem:[#allocation2 + $0x48] sm:$0xff] }
 0x1f2   : > { %2318 = vmatpush3.bf16.msra.mxu1 %v727_v48  ;;  %2305 = vmatprep.mubr.bf16.mxu1 %v2611_v16 }
 0x1f3   : > { %2319 = vmatprep.subr.bf16.mxu1 %v3306_v43 }
 0x1f6   : > { %2320 = vmatpush3.bf16.msra.mxu1 %v3306_v43  ;;  %v743_v43 = vld [vmem:[#allocation2 + $0x8] sm:$0xff] }
 0x1f7   : > { %2321 = vmatprep.subr.bf16.mxu1 %v3304_v38 }
 0x1f9   : > { %2306 = vmatmul.mubr.bf16.gmra.mxu1 %v2612_v17 }
 0x1fa   : > { %2322 = vmatpush3.bf16.msra.mxu1 %v3304_v38  ;;  %2325 = vmatprep.mubr.bf16.mxu1 %v2613_v18  ;;  %v946_v18 = vld [vmem:[#allocation2 + $0x18] sm:$0xff] }
 0x1fb   : > { %2323 = vmatprep.subr.bf16.mxu1 %v3302_v32 }
 0x1fe   : > { %2324 = vmatpush3.bf16.msra.mxu1 %v3302_v32 }
 0x201   : > { %2326 = vmatmul.mubr.bf16.vlgmr.msra.gmra.mxu1 %v2614_v19 }
 0x202   : > { %2329 = vmatprep.mubr.bf16.mxu1 %v2615_v20 }
 0x209   : > { %2330 = vmatmul.mubr.bf16.gmra.mxu1 %v2616_v21  ;;  %v951_v21 = vld [vmem:[#allocation2 + $0xf0] sm:$0xff] }
 0x20a   : > { %2333 = vmatprep.mubr.bf16.mxu1 %v2617_v22 }
 0x211   : > { %2334 = vmatmul.mubr.bf16.gmra.mxu1 %v2618_v23 }
 0x212   : > { %2337 = vmatprep.mubr.bf16.mxu1 %v2619_v24  ;;  %v949_v24 = vld [vmem:[#allocation2 + $0x88] sm:$0xff] }
 0x219   : > { %2338 = vmatmul.mubr.bf16.gmra.mxu1 %v2620_v25 }
 0x2a1   : > { %v2295_v27 = vpop.f32.mrf.mxu1 }
 0x2a2   : > { %v915_v29 = vadd.f32 %v2295_v27, %v738_v26  ;;  %v952_v27 = vld [vmem:[#allocation2 + $0x78] sm:$0xff] }
 0x2a3   : > { %v850_v30 = vpop.f32.mrf.mxu1 }
 0x2a4   : > { %931 = vst [vmem:[#allocation2 + $0x50] sm:$0xff] %v915_v29  ;;  %v913_v32 = vadd.f32 %v850_v30, %v736_v28  ;;  %v950_v30 = vld [vmem:[#allocation2 + $0xb8] sm:$0xff] }
 0x2a5   : > { %v2296_v33 = vpop.f32.mrf.mxu1 }
 0x2a6   : > { %929 = vst [vmem:[#allocation2 + $0xb0] sm:$0xff] %v913_v32  ;;  %v916_v35 = vadd.f32 %v2296_v33, %v739_v31  ;;  %v955_v33 = vld [vmem:[#allocation2 + $0x90] sm:$0xff] }
 0x2a7   : > { %v853_v36 = vpop.f32.mrf.mxu1 }
 0x2a8   : > { %932 = vst [vmem:[#allocation2 + $0x30] sm:$0xff] %v916_v35  ;;  %v914_v38 = vadd.f32 %v853_v36, %v737_v34  ;;  %v953_v36 = vld [vmem:[#allocation2 + $0x58] sm:$0xff] }
 0x2a9   : > { %v2299_v39 = vpop.f32.mrf.mxu1 }
 0x2aa   : > { %930 = vst [vmem:[#allocation2 + $0xd8] sm:$0xff] %v914_v38  ;;  %v919_v41 = vadd.f32 %v2299_v39, %v742_v37  ;;  %v956_v39 = vld [vmem:[#allocation2 + $0xc0] sm:$0xff] }
 0x2ab   : > { %v866_v42 = vpop.f32.mrf.mxu1 }
 0x2ac   : > { %935 = vst [vmem:[#allocation2 + $0x60] sm:$0xff] %v919_v41  ;;  %v917_v44 = vadd.f32 %v866_v42, %v740_v40  ;;  %v954_v42 = vld [vmem:[#allocation2 + $0xc8] sm:$0xff] }
 0x2ad   : > { %v2300_v45 = vpop.f32.mrf.mxu1 }
 0x2ae   : > { %933 = vst [vmem:[#allocation2 + $0x80] sm:$0xff] %v917_v44  ;;  %v920_v47 = vadd.f32 %v2300_v45, %v743_v43  ;;  %v959_v45 = vld [vmem:[#allocation2 + $0xf8] sm:$0xff] }
 0x2af   : > { %v869_v48 = vpop.f32.mrf.mxu1 }
 0x2b0   : > { %936 = vst [vmem:[#allocation2 + $0x8] sm:$0xff] %v920_v47  ;;  %v918_v50 = vadd.f32 %v869_v48, %v741_v46  ;;  %v957_v48 = vld [vmem:[#allocation2 + $0xd0] sm:$0xff] }
 0x2b1   : > { %v2303_v51 = vpop.f32.mrf.mxu1 }
 0x2b2   : > { %934 = vst [vmem:[#allocation2 + $0xe8] sm:$0xff] %v918_v50  ;;  %v923_v53 = vadd.f32 %v2303_v51, %v746_v49  ;;  %v960_v51 = vld [vmem:[#allocation2 + $0x98] sm:$0xff] }
 0x2b3   : > { %v882_v54 = vpop.f32.mrf.mxu1 }
 0x2b4   : > { %939 = vst [vmem:[#allocation2 + $0xe0] sm:$0xff] %v923_v53  ;;  %v921_v56 = vadd.f32 %v882_v54, %v744_v52  ;;  %v958_v54 = vld [vmem:[#allocation2 + $0x28] sm:$0xff] }
 0x2b5   : > { %v2304_v57 = vpop.f32.mrf.mxu1 }
 0x2b6   : > { %937 = vst [vmem:[#allocation2 + $0x38] sm:$0xff] %v921_v56  ;;  %v924_v59 = vadd.f32 %v2304_v57, %v747_v55 }
 0x2b7   : > { %v885_v60 = vpop.f32.mrf.mxu1 }
 0x2b8   : > { %940 = vst [vmem:[#allocation2 + $0x70] sm:$0xff] %v924_v59  ;;  %v922_v62 = vadd.f32 %v885_v60, %v745_v58 }
 0x2b9   : > { %v2307_v63 = vpop.f32.mrf.mxu1 }
 0x2ba   : > { %938 = vst [vmem:[#allocation2 + $0x40] sm:$0xff] %v922_v62  ;;  %v927_v1 = vadd.f32 %v2307_v63, %v750_v61 }
 0x2bb   : > { %v898_v2 = vpop.f32.mrf.mxu1 }
 0x2bc   : > { %943 = vst [vmem:[#allocation2 + $0xa0] sm:$0xff] %v927_v1  ;;  %v925_v4 = vadd.f32 %v898_v2, %v748_v0 }
 0x2bd   : > { %v2308_v5 = vpop.f32.mrf.mxu1 }
 0x2be   : > { %941 = vst [vmem:[#allocation2 + $0xa8] sm:$0xff] %v925_v4  ;;  %v928_v7 = vadd.f32 %v2308_v5, %v751_v3 }
 0x2bf   : > { %v901_v8 = vpop.f32.mrf.mxu1 }
 0x2c0   : > { %944 = vst [vmem:[#allocation2 + $0x20] sm:$0xff] %v928_v7  ;;  %v926_v10 = vadd.f32 %v901_v8, %v749_v6 }
 0x2c1   : > { %v2327_v11 = vpop.f32.mrf.mxu1 }
 0x2c2   : > { %942 = vst [vmem:[#allocation2 + $0x10] sm:$0xff] %v926_v10  ;;  %v1125_v13 = vadd.f32 %v2327_v11, %v947_v9 }
 0x2c3   : > { %v1060_v14 = vpop.f32.mrf.mxu1 }
 0x2c4   : > { %1141 = vst [vmem:[#allocation2 + $0x68] sm:$0xff] %v1125_v13  ;;  %v1123_v16 = vadd.f32 %v1060_v14, %v945_v12 }
 0x2c5   : > { %v2328_v17 = vpop.f32.mrf.mxu1 }
 0x2c6   : > { %1139 = vst [vmem:[#allocation2] sm:$0xff] %v1123_v16  ;;  %v1126_v19 = vadd.f32 %v2328_v17, %v948_v15 }
 0x2c7   : > { %v1063_v20 = vpop.f32.mrf.mxu1 }
 0x2c8   : > { %1142 = vst [vmem:[#allocation2 + $0x48] sm:$0xff] %v1126_v19  ;;  %v1124_v22 = vadd.f32 %v1063_v20, %v946_v18 }
 0x2c9   : > { %v2331_v23 = vpop.f32.mrf.mxu1 }
 0x2ca   : > { %1140 = vst [vmem:[#allocation2 + $0x18] sm:$0xff] %v1124_v22  ;;  %v1129_v25 = vadd.f32 %v2331_v23, %v951_v21 }
 0x2cb   : > { %v1076_v26 = vpop.f32.mrf.mxu1 }
 0x2cc   : > { %1145 = vst [vmem:[#allocation2 + $0xf0] sm:$0xff] %v1129_v25  ;;  %v1127_v28 = vadd.f32 %v1076_v26, %v949_v24 }
 0x2cd   : > { %v2332_v29 = vpop.f32.mrf.mxu1 }
 0x2ce   : > { %1143 = vst [vmem:[#allocation2 + $0x88] sm:$0xff] %v1127_v28  ;;  %v1130_v31 = vadd.f32 %v2332_v29, %v952_v27 }
 0x2cf   : > { %v1079_v32 = vpop.f32.mrf.mxu1 }
 0x2d0   : > { %1146 = vst [vmem:[#allocation2 + $0x78] sm:$0xff] %v1130_v31  ;;  %v1128_v34 = vadd.f32 %v1079_v32, %v950_v30 }
 0x2d1   : > { %v2335_v35 = vpop.f32.mrf.mxu1 }
 0x2d2   : > { %1144 = vst [vmem:[#allocation2 + $0xb8] sm:$0xff] %v1128_v34  ;;  %v1133_v37 = vadd.f32 %v2335_v35, %v955_v33 }
 0x2d3   : > { %v1092_v38 = vpop.f32.mrf.mxu1 }
 0x2d4   : > { %1149 = vst [vmem:[#allocation2 + $0x90] sm:$0xff] %v1133_v37  ;;  %v1131_v40 = vadd.f32 %v1092_v38, %v953_v36 }
 0x2d5   : > { %v2336_v41 = vpop.f32.mrf.mxu1 }
 0x2d6   : > { %1147 = vst [vmem:[#allocation2 + $0x58] sm:$0xff] %v1131_v40  ;;  %v1134_v43 = vadd.f32 %v2336_v41, %v956_v39 }
 0x2d7   : > { %v1095_v44 = vpop.f32.mrf.mxu1 }
 0x2d8   : > { %1150 = vst [vmem:[#allocation2 + $0xc0] sm:$0xff] %v1134_v43  ;;  %v1132_v46 = vadd.f32 %v1095_v44, %v954_v42 }
 0x2d9   : > { %v2339_v47 = vpop.f32.mrf.mxu1 }
 0x2da   : > { %1148 = vst [vmem:[#allocation2 + $0xc8] sm:$0xff] %v1132_v46  ;;  %v1137_v49 = vadd.f32 %v2339_v47, %v959_v45 }
 0x2db   : > { %v1108_v50 = vpop.f32.mrf.mxu1 }
 0x2dc   : > { %1153 = vst [vmem:[#allocation2 + $0xf8] sm:$0xff] %v1137_v49  ;;  %v1135_v52 = vadd.f32 %v1108_v50, %v957_v48 }
 0x2dd   : > { %v2340_v53 = vpop.f32.mrf.mxu1 }
 0x2de   : > { %1151 = vst [vmem:[#allocation2 + $0xd0] sm:$0xff] %v1135_v52  ;;  %v1138_v55 = vadd.f32 %v2340_v53, %v960_v51  ;;  %1158 = sbr.rel (%p2113_p0) target bundleno = 1226 (0x4ca), region = 72 }
 0x2df   : > { %v1111_v56 = vpop.f32.mrf.mxu1 }
 0x2e0   : > { %1154 = vst [vmem:[#allocation2 + $0x98] sm:$0xff] %v1138_v55  ;;  %v1136_v57 = vadd.f32 %v1111_v56, %v958_v54 }
 0x2e2   : > { %1152 = vst [vmem:[#allocation2 + $0x28] sm:$0xff] %v1136_v57 }
 0x2e3   : > { %v2621_v58 = vld [vmem:[#allocation9 + $0x38] sm:$0xff]   ;;  %v2622_v59 = vld [vmem:[#allocation9 + $0x30] sm:$0xff]   ;;  %v2623_v60 = vld [vmem:[#allocation9 + $0x28] sm:$0xff]  }
 0x2e4   : > { %2341 = vmatprep.subr.bf16.mxu0 %v2621_v58  ;;  %2373 = vmatprep.subr.bf16.mxu1 %v2621_v58  ;;  %v2624_v61 = vld [vmem:[#allocation9 + $0x20] sm:$0xff]   ;;  %v1177_v62 = vld [vmem:[#allocation2 + $0xb0] sm:$0xff]  ;;  %v1178_v63 = vld [vmem:[#allocation2 + $0xd8] sm:$0xff] }
 0x2e5   : > { %2342 = vmatpush3.bf16.msra.mxu0 %v2621_v58  ;;  %2374 = vmatpush3.bf16.msra.mxu1 %v2621_v58  ;;  %v3333_v0 = vld [vmem:[%s3729_s11] ss:$0 sm:$0xff]  ;;  %v1446_v4 = vld [vmem:[#allocation2 + $0x18] sm:$0xff]  ;;  %v3344_v5 = vld [vmem:[%s3730_s16 + $0x1] ss:$0 sm:$0xff] }
 0x2e6   : > { %2343 = vmatprep.subr.bf16.mxu0 %v2622_v59  ;;  %2375 = vmatprep.subr.bf16.mxu1 %v2622_v59  ;;  %v3336_v1 = vadd.f32 %v3333_v0, %v1177_v62  ;;  %v3339_v2 = vadd.f32 %v3333_v0, %v1178_v63  ;;  %v1445_v3 = vld [vmem:[#allocation2] sm:$0xff]  ;;  %v3350_v7 = vadd.f32 %v3344_v5, %v1446_v4  ;;  %v2625_v9 = vld [vmem:[#allocation9 + $0x18] sm:$0xff]   ;;  %v2626_v11 = vld [vmem:[#allocation9 + $0x10] sm:$0xff]  }
 0x2e7   : > { %v3347_v6 = vadd.f32 %v3344_v5, %v1445_v3  ;;  %v2627_v12 = vld [vmem:[#allocation9 + $0x8] sm:$0xff]   ;;  %v2628_v13 = vld [vmem:[#allocation9] sm:$0xff]   ;;  %v1179_v14 = vld [vmem:[#allocation2 + $0x50] sm:$0xff] }
 0x2e8   : > { %v1216_v8 = vpack.c.bf16 %v3339_v2, %v3336_v1  ;;  %v1180_v15 = vld [vmem:[#allocation2 + $0x30] sm:$0xff]  ;;  %v1447_v16 = vld [vmem:[#allocation2 + $0x68] sm:$0xff]  ;;  %v1181_v18 = vld [vmem:[#allocation2 + $0x80] sm:$0xff]  ;;  %v3357_v22 = vadd.f32 %v3333_v0, %v1179_v14 }
 0x2e9   : > { %2344 = vmatpush3.bf16.msra.mxu0 %v2622_v59  ;;  %2376 = vmatpush3.bf16.msra.mxu1 %v2622_v59  ;;  %v1484_v10 = vpack.c.bf16 %v3350_v7, %v3347_v6  ;;  %v1448_v17 = vld [vmem:[#allocation2 + $0x48] sm:$0xff]  ;;  %v1450_v21 = vld [vmem:[#allocation2 + $0xb8] sm:$0xff]  ;;  %v3360_v23 = vadd.f32 %v3333_v0, %v1180_v15  ;;  %v3363_v24 = vadd.f32 %v3344_v5, %v1447_v16  ;;  %v1183_v32 = vld [vmem:[#allocation2 + $0x60] sm:$0xff] }
 0x2ea   : > { %2345 = vmatprep.subr.bf16.mxu0 %v2623_v60  ;;  %2377 = vmatprep.subr.bf16.mxu1 %v2623_v60  ;;  %v1182_v19 = vld [vmem:[#allocation2 + $0xe8] sm:$0xff]  ;;  %v3366_v25 = vadd.f32 %v3344_v5, %v1448_v17  ;;  %v3369_v26 = vadd.f32 %v3333_v0, %v1181_v18  ;;  %v3378_v29 = vadd.f32 %v3344_v5, %v1450_v21  ;;  %v1451_v36 = vld [vmem:[#allocation2 + $0xf0] sm:$0xff]  ;;  %v1452_v37 = vld [vmem:[#allocation2 + $0x78] sm:$0xff] }
 0x2eb   : > { %2357 = vmatprep.mubr.bf16.mxu0 %v1216_v8  ;;  %2389 = vmatprep.mubr.bf16.mxu1 %v1484_v10  ;;  %v1449_v20 = vld [vmem:[#allocation2 + $0x88] sm:$0xff]  ;;  %v3372_v27 = vadd.f32 %v3333_v0, %v1182_v19  ;;  %v1217_v30 = vpack.c.bf16 %v3360_v23, %v3357_v22  ;;  %v1185_v38 = vld [vmem:[#allocation2 + $0x38] sm:$0xff]  ;;  %v1186_v39 = vld [vmem:[#allocation2 + $0x40] sm:$0xff]  ;;  %v3389_v42 = vadd.f32 %v3333_v0, %v1183_v32 }
 0x2ec   : > { %v3375_v28 = vadd.f32 %v3344_v5, %v1449_v20  ;;  %v1485_v31 = vpack.c.bf16 %v3366_v25, %v3363_v24  ;;  %v1184_v33 = vld [vmem:[#allocation2 + $0x8] sm:$0xff]  ;;  %v1453_v40 = vld [vmem:[#allocation2 + $0x58] sm:$0xff]  ;;  %v3395_v44 = vadd.f32 %v3344_v5, %v1451_v36  ;;  %v3398_v45 = vadd.f32 %v3344_v5, %v1452_v37  ;;  %v1187_v52 = vld [vmem:[#allocation2 + $0xe0] sm:$0xff] }
 0x2ed   : > { %2346 = vmatpush3.bf16.msra.mxu0 %v2623_v60  ;;  %2378 = vmatpush3.bf16.msra.mxu1 %v2623_v60  ;;  %v1218_v34 = vpack.c.bf16 %v3372_v27, %v3369_v26  ;;  %v1454_v41 = vld [vmem:[#allocation2 + $0xc8] sm:$0xff]  ;;  %v3392_v43 = vadd.f32 %v3333_v0, %v1184_v33  ;;  %v3401_v46 = vadd.f32 %v3333_v0, %v1185_v38  ;;  %v1188_v53 = vld [vmem:[#allocation2 + $0x70] sm:$0xff]  ;;  %v1456_v57 = vld [vmem:[#allocation2 + $0xc0] sm:$0xff] }
 0x2ee   : > { %2347 = vmatprep.subr.bf16.mxu0 %v2624_v61  ;;  %2379 = vmatprep.subr.bf16.mxu1 %v2624_v61  ;;  %v1486_v35 = vpack.c.bf16 %v3378_v29, %v3375_v28  ;;  %v3404_v47 = vadd.f32 %v3333_v0, %v1186_v39  ;;  %v3407_v48 = vadd.f32 %v3344_v5, %v1453_v40  ;;  %v1455_v56 = vld [vmem:[#allocation2 + $0x90] sm:$0xff]  ;;  %v1189_v58 = vld [vmem:[#allocation2 + $0xa8] sm:$0xff]  ;;  %v1191_v14 = vld [vmem:[#allocation2 + $0xa0] sm:$0xff] }
 0x2ef   : > { %v3410_v49 = vadd.f32 %v3344_v5, %v1454_v41  ;;  %v1219_v50 = vpack.c.bf16 %v3392_v43, %v3389_v42  ;;  %v1487_v51 = vpack.c.bf16 %v3398_v45, %v3395_v44  ;;  %v1190_v59 = vld [vmem:[#allocation2 + $0x10] sm:$0xff]  ;;  %v3421_v62 = vadd.f32 %v3333_v0, %v1187_v52  ;;  %v1192_v16 = vld [vmem:[#allocation2 + $0x20] sm:$0xff]  ;;  %v1459_v18 = vld [vmem:[#allocation2 + $0xf8] sm:$0xff] }
 0x2f0   : > { %v1220_v54 = vpack.c.bf16 %v3404_v47, %v3401_v46  ;;  %v1457_v60 = vld [vmem:[#allocation2 + $0xd0] sm:$0xff]  ;;  %v3424_v63 = vadd.f32 %v3333_v0, %v1188_v53  ;;  %v3427_v3 = vadd.f32 %v3344_v5, %v1455_v56  ;;  %v3430_v4 = vadd.f32 %v3344_v5, %v1456_v57  ;;  %v1460_v19 = vld [vmem:[#allocation2 + $0x98] sm:$0xff] }
 0x2f1   : > { %2348 = vmatpush3.bf16.msra.mxu0 %v2624_v61  ;;  %2380 = vmatpush3.bf16.msra.mxu1 %v2624_v61  ;;  %v1488_v55 = vpack.c.bf16 %v3410_v49, %v3407_v48  ;;  %v1458_v61 = vld [vmem:[#allocation2 + $0x28] sm:$0xff]  ;;  %v3433_v8 = vadd.f32 %v3333_v0, %v1189_v58  ;;  %v3439_v10 = vadd.f32 %v3344_v5, %v1457_v60 }
 0x2f2   : > { %2349 = vmatprep.subr.bf16.mxu0 %v2625_v9  ;;  %2381 = vmatprep.subr.bf16.mxu1 %v2625_v9  ;;  %v3453_v20 = vadd.f32 %v3333_v0, %v1191_v14  ;;  %v3456_v21 = vadd.f32 %v3333_v0, %v1192_v16  ;;  %v3486_v14 = vld [vmem:[%s3732_s7] ss:$0 sm:$0xff] }
 0x2f4   : > { %v1223_v32 = vpack.c.bf16 %v3456_v21, %v3453_v20 }
 0x2f5   : > { %2350 = vmatpush3.bf16.msra.mxu0 %v2625_v9  ;;  %2382 = vmatpush3.bf16.msra.mxu1 %v2625_v9  ;;  %v3436_v9 = vadd.f32 %v3333_v0, %v1190_v59  ;;  %v3471_v0 = vld [vmem:[%s3731_s5] ss:$0 sm:$0xff] }
 0x2f6   : > { %2351 = vmatprep.subr.bf16.mxu0 %v2626_v11  ;;  %2383 = vmatprep.subr.bf16.mxu1 %v2626_v11 }
 0x2f7   : > { %v1222_v15 = vpack.c.bf16 %v3436_v9, %v3433_v8 }
 0x2f9   : > { %2352 = vmatpush3.bf16.msra.mxu0 %v2626_v11  ;;  %2384 = vmatpush3.bf16.msra.mxu1 %v2626_v11  ;;  %v3442_v11 = vadd.f32 %v3344_v5, %v1458_v61 }
 0x2fa   : > { %2353 = vmatprep.subr.bf16.mxu0 %v2627_v12  ;;  %2385 = vmatprep.subr.bf16.mxu1 %v2627_v12 }
 0x2fb   : > { %v1490_v17 = vpack.c.bf16 %v3442_v11, %v3439_v10 }
 0x2fd   : > { %2354 = vmatpush3.bf16.msra.mxu0 %v2627_v12  ;;  %2386 = vmatpush3.bf16.msra.mxu1 %v2627_v12  ;;  %v1221_v12 = vpack.c.bf16 %v3424_v63, %v3421_v62 }
 0x2fe   : > { %2355 = vmatprep.subr.bf16.mxu0 %v2628_v13  ;;  %2387 = vmatprep.subr.bf16.mxu1 %v2628_v13 }
 0x301   : > { %2356 = vmatpush3.bf16.msra.mxu0 %v2628_v13  ;;  %2388 = vmatpush3.bf16.msra.mxu1 %v2628_v13  ;;  %v1489_v13 = vpack.c.bf16 %v3430_v4, %v3427_v3 }
 0x304   : > { %2358 = vmatmul.mubr.bf16.vlgmr.msra.gmra.mxu0 %v1217_v30  ;;  %2390 = vmatmul.mubr.bf16.vlgmr.msra.gmra.mxu1 %v1485_v31  ;;  %v3459_v30 = vadd.f32 %v3344_v5, %v1459_v18  ;;  %v3462_v31 = vadd.f32 %v3344_v5, %v1460_v19 }
 0x305   : > { %2361 = vmatprep.mubr.bf16.mxu0 %v1218_v34  ;;  %2393 = vmatprep.mubr.bf16.mxu1 %v1486_v35 }
 0x306   : > { %v1491_v33 = vpack.c.bf16 %v3462_v31, %v3459_v30 }
 0x30c   : > { %2362 = vmatmul.mubr.bf16.gmra.mxu0 %v1219_v50  ;;  %2394 = vmatmul.mubr.bf16.gmra.mxu1 %v1487_v51 }
 0x30d   : > { %2365 = vmatprep.mubr.bf16.mxu0 %v1220_v54  ;;  %2397 = vmatprep.mubr.bf16.mxu1 %v1488_v55 }
 0x314   : > { %2366 = vmatmul.mubr.bf16.gmra.mxu0 %v1221_v12  ;;  %2398 = vmatmul.mubr.bf16.gmra.mxu1 %v1489_v13 }
 0x315   : > { %2369 = vmatprep.mubr.bf16.mxu0 %v1222_v15  ;;  %2401 = vmatprep.mubr.bf16.mxu1 %v1490_v17 }
 0x31c   : > { %2370 = vmatmul.mubr.bf16.gmra.mxu0 %v1223_v32  ;;  %2402 = vmatmul.mubr.bf16.gmra.mxu1 %v1491_v33 }
 0x3c4   : > { %v2359_v34 = vpop.f32.mrf.mxu0  ;;  %v2391_v35 = vpop.f32.mrf.mxu1 }
 0x3c5   : > { %v1321_v5 = vadd.f32 %v2359_v34, %v3471_v0  ;;  %v1535_v36 = vadd.f32 %v2391_v35, %v3471_v0 }
 0x3c6   : > { %v1312_v37 = vpop.f32.mrf.mxu0  ;;  %v1526_v38 = vpop.f32.mrf.mxu1 }
 0x3c7   : > { %2629 = vtanh.f32 %v1321_v5  ;;  %v1313_v39 = vadd.f32 %v3471_v0, %v1312_v37  ;;  %v1527_v52 = vadd.f32 %v3471_v0, %v1526_v38 }
 0x3c8   : > { %2631 = vtanh.f32 %v1535_v36  ;;  %v2360_v40 = vpop.f32.mrf.mxu0  ;;  %v2392_v41 = vpop.f32.mrf.mxu1 }
 0x3c9   : > { %v1324_v50 = vadd.f32 %v2360_v40, %v3471_v0  ;;  %v1538_v51 = vadd.f32 %v2392_v41, %v3471_v0  ;;  %2633 = vtanh.f32 %v1313_v39 }
 0x3ca   : > { %v1315_v53 = vpop.f32.mrf.mxu0  ;;  %v1529_v54 = vpop.f32.mrf.mxu1 }
 0x3cb   : > { %2635 = vtanh.f32 %v1324_v50  ;;  %v1530_v57 = vadd.f32 %v3471_v0, %v1529_v54  ;;  %v1316_v58 = vadd.f32 %v3471_v0, %v1315_v53 }
 0x3cc   : > { %v2363_v55 = vpop.f32.mrf.mxu0  ;;  %v2395_v56 = vpop.f32.mrf.mxu1  ;;  %2637 = vtanh.f32 %v1538_v51 }
 0x3cd   : > { %2639 = vtanh.f32 %v1527_v52  ;;  %v1337_v13 = vadd.f32 %v2363_v55, %v3471_v0  ;;  %v1551_v32 = vadd.f32 %v2395_v56, %v3471_v0 }
 0x3ce   : > { %v1328_v59 = vpop.f32.mrf.mxu0  ;;  %v1542_v61 = vpop.f32.mrf.mxu1  ;;  %2641 = vtanh.f32 %v1530_v57 }
 0x3cf   : > { %2643 = vtanh.f32 %v1316_v58  ;;  %v1329_v40 = vadd.f32 %v3471_v0, %v1328_v59  ;;  %v1543_v57 = vadd.f32 %v3471_v0, %v1542_v61 }
 0x3d0   : > { %v2364_v60 = vpop.f32.mrf.mxu0  ;;  %v2396_v16 = vpop.f32.mrf.mxu1 }
 0x3d1   : > { %v1340_v12 = vadd.f32 %v2364_v60, %v3471_v0  ;;  %v1554_v18 = vadd.f32 %v2396_v16, %v3471_v0 }
 0x3d2   : > { %v1331_v33 = vpop.f32.mrf.mxu0  ;;  %v1545_v41 = vpop.f32.mrf.mxu1 }
 0x3d3   : > { %2645 = vtanh.f32 %v1340_v12  ;;  %v1332_v37 = vadd.f32 %v3471_v0, %v1331_v33  ;;  %v1546_v54 = vadd.f32 %v3471_v0, %v1545_v41 }
 0x3d4   : > { %v2630_v15 = vpop.eup %2629  ;;  %2647 = vtanh.f32 %v1337_v13  ;;  %v2367_v36 = vpop.f32.mrf.mxu0 }
 0x3d5   : > { %v2632_v17 = vpop.eup %2631  ;;  %v1399_v19 = vmul.f32 %v2630_v15, %v3486_v14  ;;  %2649 = vtanh.f32 %v1554_v18  ;;  %v2399_v53 = vpop.f32.mrf.mxu1 }
 0x3d6   : > { %v1607_v34 = vmul.f32 %v2632_v17, %v3486_v14  ;;  %v2634_v35 = vpop.eup %2633  ;;  %2651 = vtanh.f32 %v1551_v32  ;;  %v1344_v52 = vpop.f32.mrf.mxu0  ;;  %v1353_v17 = vadd.f32 %v2367_v36, %v3471_v0 }
 0x3d7   : > { %1417 = vadd.xlane.f32.xlu1 %v1399_v19  ;;  %v1397_v50 = vmul.f32 %v2634_v35, %v3486_v14  ;;  %2653 = vtanh.f32 %v1332_v37  ;;  %v1558_v12 = vpop.f32.mrf.mxu1 }
 0x3d8   : > { %v2636_v5 = vpop.eup %2635  ;;  %1625 = vadd.xlane.f32.xlu0 %v1607_v34  ;;  %2655 = vtanh.f32 %v1329_v40  ;;  %v2368_v60 = vpop.f32.mrf.mxu0 }
 0x3d9   : > { %v1400_v38 = vmul.f32 %v2636_v5, %v3486_v14  ;;  %v2638_v39 = vpop.eup %2637  ;;  %2657 = vtanh.f32 %v1546_v54  ;;  %v1356_v13 = vadd.f32 %v2368_v60, %v3471_v0  ;;  %v2400_v32 = vpop.f32.mrf.mxu1  ;;  %v1567_v5 = vadd.f32 %v2399_v53, %v3471_v0 }
 0x3da   : > { %v2640_v51 = vpop.eup %2639  ;;  %v1608_v55 = vmul.f32 %v2638_v39, %v3486_v14  ;;  %2659 = vtanh.f32 %v1543_v57  ;;  %v1347_v61 = vpop.f32.mrf.mxu0  ;;  %v1570_v33 = vadd.f32 %v2400_v32, %v3471_v0  ;;  %v1559_v60 = vadd.f32 %v3471_v0, %v1558_v12 }
 0x3db   : > { %1419 = vadd.xlane.f32.xlu1 %v1400_v38  ;;  %v2642_v56 = vpop.eup %2641  ;;  %v1605_v58 = vmul.f32 %v2640_v51, %v3486_v14  ;;  %2661 = vtanh.f32 %v1356_v13  ;;  %v1561_v39 = vpop.f32.mrf.mxu1  ;;  %v1348_v40 = vadd.f32 %v3471_v0, %v1347_v61  ;;  %v1345_v51 = vadd.f32 %v3471_v0, %v1344_v52 }
 0x3dc   : > { %1413 = vadd.xlane.f32.xlu0 %v1397_v50  ;;  %v2644_v59 = vpop.eup %2643  ;;  %v1606_v15 = vmul.f32 %v2642_v56, %v3486_v14  ;;  %2663 = vtanh.f32 %v1353_v17  ;;  %v2371_v38 = vpop.f32.mrf.mxu0  ;;  %v1562_v57 = vadd.f32 %v3471_v0, %v1561_v39 }
 0x3dd   : > { %v1398_v18 = vmul.f32 %v2644_v59, %v3486_v14  ;;  %2665 = vtanh.f32 %v1570_v33  ;;  %v2403_v53 = vpop.f32.mrf.mxu1  ;;  %v1369_v61 = vadd.f32 %v2371_v38, %v3471_v0 }
 0x3de   : > { %2667 = vtanh.f32 %v1567_v5 }
 0x3df   : > { %1627 = vadd.xlane.f32.xlu1 %v1608_v55  ;;  %v1360_v55 = vpop.f32.mrf.mxu0  ;;  %2669 = vtanh.f32 %v1348_v40 }
 0x3e0   : > { %1621 = vadd.xlane.f32.xlu0 %v1605_v58  ;;  %v2646_v16 = vpop.eup %2645  ;;  %2671 = vtanh.f32 %v1345_v51 }
 0x3e1   : > { %v2648_v19 = vpop.eup %2647  ;;  %v1404_v34 = vmul.f32 %v2646_v16, %v3486_v14  ;;  %v2372_v13 = vpop.f32.mrf.mxu0  ;;  %2673 = vtanh.f32 %v1562_v57 }
 0x3e2   : > { %v2650_v35 = vpop.eup %2649  ;;  %v1403_v37 = vmul.f32 %v2648_v19, %v3486_v14  ;;  %v1372_v17 = vadd.f32 %v2372_v13, %v3471_v0  ;;  %2675 = vtanh.f32 %v1559_v60  ;;  %v1583_v60 = vadd.f32 %v2403_v53, %v3471_v0 }
 0x3e3   : > { %1623 = vadd.xlane.f32.xlu1 %v1606_v15  ;;  %v2652_v36 = vpop.eup %2651  ;;  %v1612_v41 = vmul.f32 %v2650_v35, %v3486_v14  ;;  %v1574_v15 = vpop.f32.mrf.mxu1 }
 0x3e4   : > { %1415 = vadd.xlane.f32.xlu0 %v1398_v18  ;;  %v2654_v50 = vpop.eup %2653  ;;  %v1611_v54 = vmul.f32 %v2652_v36, %v3486_v14  ;;  %v1363_v32 = vpop.f32.mrf.mxu0  ;;  %2677 = vtanh.f32 %v1372_v17  ;;  %v1361_v36 = vadd.f32 %v3471_v0, %v1360_v55 }
 0x3e5   : > { %v2656_v56 = vpop.eup %2655  ;;  %v1402_v58 = vmul.f32 %v2654_v50, %v3486_v14  ;;  %v2404_v12 = vpop.f32.mrf.mxu1  ;;  %v1364_v35 = vadd.f32 %v3471_v0, %v1363_v32  ;;  %2679 = vtanh.f32 %v1369_v61 }
 0x3e6   : > { %v2658_v59 = vpop.eup %2657  ;;  %v1401_v52 = vmul.f32 %v2656_v56, %v3486_v14  ;;  %v1586_v55 = vadd.f32 %v2404_v12, %v3471_v0 }
 0x3e7   : > { %1427 = vadd.xlane.f32.xlu1 %v1404_v34  ;;  %v2660_v16 = vpop.eup %2659  ;;  %v1610_v18 = vmul.f32 %v2658_v59, %v3486_v14  ;;  %v1577_v39 = vpop.f32.mrf.mxu1  ;;  %2681 = vtanh.f32 %v1364_v35 }
 0x3e8   : > { %1425 = vadd.xlane.f32.xlu0 %v1403_v37  ;;  %v2662_v19 = vpop.eup %2661  ;;  %v1609_v33 = vmul.f32 %v2660_v16, %v3486_v14  ;;  %2683 = vtanh.f32 %v1361_v36 }
 0x3e9   : > { %v2664_v34 = vpop.eup %2663  ;;  %v1408_v5 = vmul.f32 %v2662_v19, %v3486_v14 }
 0x3ea   : > { %v2666_v37 = vpop.eup %2665  ;;  %v1407_v40 = vmul.f32 %v2664_v34, %v3486_v14 }
 0x3eb   : > { %1635 = vadd.xlane.f32.xlu1 %v1612_v41  ;;  %v2668_v38 = vpop.eup %2667  ;;  %v1578_v41 = vadd.f32 %v3471_v0, %v1577_v39  ;;  %v1616_v50 = vmul.f32 %v2666_v37, %v3486_v14 }
 0x3ec   : > { %1633 = vadd.xlane.f32.xlu0 %v1611_v54  ;;  %v2670_v51 = vpop.eup %2669  ;;  %v1575_v54 = vadd.f32 %v3471_v0, %v1574_v15  ;;  %v1615_v56 = vmul.f32 %v2668_v38, %v3486_v14 }
 0x3ed   : > { %v2672_v57 = vpop.eup %2671  ;;  %2685 = vtanh.f32 %v1578_v41 }
 0x3ee   : > { %v2674_v59 = vpop.eup %2673  ;;  %2687 = vtanh.f32 %v1575_v54  ;;  %v1405_v13 = vmul.f32 %v2672_v57, %v3486_v14 }
 0x3ef   : > { %1423 = vadd.xlane.f32.xlu1 %v1402_v58  ;;  %v1406_v58 = vmul.f32 %v2670_v51, %v3486_v14  ;;  %2689 = vtanh.f32 %v1586_v55  ;;  %v1614_v15 = vmul.f32 %v2674_v59, %v3486_v14 }
 0x3f0   : > { %1421 = vadd.xlane.f32.xlu0 %v1401_v52  ;;  %v2676_v52 = vpop.eup %2675  ;;  %2691 = vtanh.f32 %v1583_v60 }
 0x3f1   : > { %v2678_v16 = vpop.eup %2677  ;;  %v1613_v17 = vmul.f32 %v2676_v52, %v3486_v14 }
 0x3f2   : > { %v1412_v19 = vmul.f32 %v2678_v16, %v3486_v14 }
 0x3f3   : > { %1631 = vadd.xlane.f32.xlu1 %v1610_v18  ;;  %v2680_v18 = vpop.eup %2679 }
 0x3f4   : > { %1629 = vadd.xlane.f32.xlu0 %v1609_v33  ;;  %v2682_v61 = vpop.eup %2681  ;;  %v1411_v0 = vmul.f32 %v2680_v18, %v3486_v14 }
 0x3f5   : > { %v2684_v53 = vpop.eup %2683  ;;  %v1410_v32 = vmul.f32 %v2682_v61, %v3486_v14 }
 0x3f6   : > { %v1409_v12 = vmul.f32 %v2684_v53, %v3486_v14 }
 0x3f7   : > { %1435 = vadd.xlane.f32.xlu1 %v1408_v5 }
 0x3f8   : > { %1433 = vadd.xlane.f32.xlu0 %v1407_v40 }
 0x3fa   : > { %v2686_v33 = vpop.eup %2685 }
 0x3fb   : > { %1643 = vadd.xlane.f32.xlu1 %v1616_v50  ;;  %v2688_v34 = vpop.eup %2687  ;;  %v1618_v35 = vmul.f32 %v2686_v33, %v3486_v14 }
 0x3fc   : > { %1641 = vadd.xlane.f32.xlu0 %v1615_v56  ;;  %v2690_v5 = vpop.eup %2689  ;;  %v1617_v37 = vmul.f32 %v2688_v34, %v3486_v14 }
 0x3fd   : > { %v2692_v36 = vpop.eup %2691  ;;  %v1620_v39 = vmul.f32 %v2690_v5, %v3486_v14 }
 0x3fe   : > { %v1619_v40 = vmul.f32 %v2692_v36, %v3486_v14 }
 0x3ff   : > { %1431 = vadd.xlane.f32.xlu1 %v1406_v58 }
 0x400   : > { %1429 = vadd.xlane.f32.xlu0 %v1405_v13 }
 0x403   : > { %1639 = vadd.xlane.f32.xlu1 %v1614_v15 }
 0x404   : > { %1637 = vadd.xlane.f32.xlu0 %v1613_v17 }
 0x407   : > { %1443 = vadd.xlane.f32.xlu1 %v1412_v19 }
 0x408   : > { %1441 = vadd.xlane.f32.xlu0 %v1411_v0 }
 0x40b   : > { %1439 = vadd.xlane.f32.xlu1 %v1410_v32 }
 0x40c   : > { %1437 = vadd.xlane.f32.xlu0 %v1409_v12 }
 0x40f   : > { %1647 = vadd.xlane.f32.xlu1 %v1618_v35 }
 0x410   : > { %1645 = vadd.xlane.f32.xlu0 %v1617_v37 }
 0x413   : > { %1651 = vadd.xlane.f32.xlu1 %v1620_v39 }
 0x414   : > { %1649 = vadd.xlane.f32.xlu0 %v1619_v40 }
 0x460   : > { %v1418_v38 = vpop.xlane.xlu1 %1417 }
 0x461   : > { %v1626_v41 = vpop.xlane.xlu0 %1625 }
 0x462   : > { %v1655_v50 = vsub.f32 %v1626_v41, %v1418_v38 }
 0x464   : > { %v1673_v51 = vmul.f32 1.442695, %v1655_v50  ;;  %v1420_v54 = vpop.xlane.xlu1 %1419 }
 0x465   : > { %v1414_v56 = vpop.xlane.xlu0 %1413 }
 0x466   : > { %2693 = vpow2.f32 %v1673_v51 }
 0x468   : > { %v1628_v57 = vpop.xlane.xlu1 %1627 }
 0x469   : > { %v1656_v55 = vsub.f32 %v1628_v57, %v1420_v54  ;;  %v1622_v58 = vpop.xlane.xlu0 %1621 }
 0x46a   : > { %v1653_v59 = vsub.f32 %v1622_v58, %v1414_v56 }
 0x46b   : > { %v1675_v60 = vmul.f32 1.442695, %v1656_v55 }
 0x46c   : > { %v1669_v13 = vmul.f32 1.442695, %v1653_v59  ;;  %v1624_v52 = vpop.xlane.xlu1 %1623 }
 0x46d   : > { %2695 = vpow2.f32 %v1675_v60  ;;  %v1416_v15 = vpop.xlane.xlu0 %1415 }
 0x46e   : > { %2697 = vpow2.f32 %v1669_v13  ;;  %v1654_v14 = vsub.f32 %v1624_v52, %v1416_v15 }
 0x470   : > { %v1671_v16 = vmul.f32 1.442695, %v1654_v14  ;;  %v1428_v17 = vpop.xlane.xlu1 %1427 }
 0x471   : > { %v1426_v18 = vpop.xlane.xlu0 %1425 }
 0x472   : > { %2699 = vpow2.f32 %v1671_v16 }
 0x473   : > { %v2694_v19 = vpop.eup %2693 }
 0x474   : > { %v1703_v61 = vadd.f32 1.0, %v2694_v19  ;;  %v1636_v0 = vpop.xlane.xlu1 %1635 }
 0x475   : > { %v1660_v53 = vsub.f32 %v1636_v0, %v1428_v17  ;;  %v1634_v32 = vpop.xlane.xlu0 %1633 }
 0x476   : > { %v1659_v33 = vsub.f32 %v1634_v32, %v1426_v18  ;;  %2701 = vrcp.f32 %v1703_v61 }
 0x477   : > { %v1683_v12 = vmul.f32 1.442695, %v1660_v53 }
 0x478   : > { %v1681_v34 = vmul.f32 1.442695, %v1659_v33  ;;  %v1424_v35 = vpop.xlane.xlu1 %1423 }
 0x479   : > { %2703 = vpow2.f32 %v1683_v12  ;;  %v1422_v5 = vpop.xlane.xlu0 %1421 }
 0x47a   : > { %v2696_v37 = vpop.eup %2695  ;;  %2705 = vpow2.f32 %v1681_v34 }
 0x47b   : > { %v2698_v36 = vpop.eup %2697  ;;  %v1704_v39 = vadd.f32 1.0, %v2696_v37 }
 0x47c   : > { %v1701_v40 = vadd.f32 1.0, %v2698_v36  ;;  %v1632_v38 = vpop.xlane.xlu1 %1631 }
 0x47d   : > { %2707 = vrcp.f32 %v1704_v39  ;;  %v1658_v41 = vsub.f32 %v1632_v38, %v1424_v35  ;;  %v1630_v50 = vpop.xlane.xlu0 %1629 }
 0x47e   : > { %2709 = vrcp.f32 %v1701_v40  ;;  %v1657_v51 = vsub.f32 %v1630_v50, %v1422_v5 }
 0x47f   : > { %v2700_v54 = vpop.eup %2699  ;;  %v1679_v56 = vmul.f32 1.442695, %v1658_v41 }
 0x480   : > { %v1702_v57 = vadd.f32 1.0, %v2700_v54  ;;  %v1677_v55 = vmul.f32 1.442695, %v1657_v51  ;;  %v1436_v58 = vpop.xlane.xlu1 %1435 }
 0x481   : > { %2711 = vpow2.f32 %v1679_v56  ;;  %v1434_v59 = vpop.xlane.xlu0 %1433 }
 0x482   : > { %2713 = vrcp.f32 %v1702_v57 }
 0x483   : > { %2715 = vpow2.f32 %v1677_v55  ;;  %v2702_v60 = vpop.eup %2701 }
 0x484   : > { %v1644_v13 = vpop.xlane.xlu1 %1643  ;;  %v1751_v18 = vsub.f32 1.0, %v2702_v60  ;;  %v1767_v39 = vmul.f32 %v2702_v60, %v3357_v22 }
 0x485   : > { %v1664_v52 = vsub.f32 %v1644_v13, %v1436_v58  ;;  %v1642_v15 = vpop.xlane.xlu0 %1641 }
 0x486   : > { %v2704_v14 = vpop.eup %2703  ;;  %v1663_v16 = vsub.f32 %v1642_v15, %v1434_v59  ;;  %v1783_v35 = vmul.f32 %v1751_v18, %v3363_v24 }
 0x487   : > { %v2706_v17 = vpop.eup %2705  ;;  %v1708_v19 = vadd.f32 1.0, %v2704_v14  ;;  %v1691_v61 = vmul.f32 1.442695, %v1664_v52 }
 0x488   : > { %v1707_v0 = vadd.f32 1.0, %v2706_v17  ;;  %v1689_v53 = vmul.f32 1.442695, %v1663_v16  ;;  %v1432_v32 = vpop.xlane.xlu1 %1431  ;;  %v1799_v57 = vadd.f32 %v1783_v35, %v1767_v39 }
 0x489   : > { %2717 = vrcp.f32 %v1708_v19  ;;  %v1430_v33 = vpop.xlane.xlu0 %1429 }
 0x48a   : > { %v2708_v12 = vpop.eup %2707  ;;  %2719 = vrcp.f32 %v1707_v0 }
 0x48b   : > { %v2710_v34 = vpop.eup %2709  ;;  %v1752_v5 = vsub.f32 1.0, %v2708_v12  ;;  %2721 = vpow2.f32 %v1691_v61  ;;  %v1768_v40 = vmul.f32 %v2708_v12, %v3360_v23 }
 0x48c   : > { %v1749_v37 = vsub.f32 1.0, %v2710_v34  ;;  %2723 = vpow2.f32 %v1689_v53  ;;  %v1640_v36 = vpop.xlane.xlu1 %1639  ;;  %v1765_v14 = vmul.f32 %v2710_v34, %v3336_v1 }
 0x48d   : > { %v1784_v38 = vmul.f32 %v1752_v5, %v3366_v25  ;;  %v1662_v41 = vsub.f32 %v1640_v36, %v1432_v32  ;;  %v1638_v50 = vpop.xlane.xlu0 %1637 }
 0x48e   : > { %v2712_v51 = vpop.eup %2711  ;;  %v1661_v54 = vsub.f32 %v1638_v50, %v1430_v33  ;;  %v1781_v13 = vmul.f32 %v1749_v37, %v3347_v6 }
 0x48f   : > { %v2714_v56 = vpop.eup %2713  ;;  %v1800_v55 = vadd.f32 %v1784_v38, %v1768_v40  ;;  %v1706_v24 = vadd.f32 1.0, %v2712_v51  ;;  %v1687_v58 = vmul.f32 1.442695, %v1662_v41 }
 0x490   : > { %v2716_v59 = vpop.eup %2715  ;;  %v1750_v52 = vsub.f32 1.0, %v2714_v56  ;;  %v1685_v15 = vmul.f32 1.442695, %v1661_v54  ;;  %v1444_v22 = vpop.xlane.xlu1 %1443  ;;  %v1766_v16 = vmul.f32 %v2714_v56, %v3339_v2  ;;  %v1797_v18 = vadd.f32 %v1781_v13, %v1765_v14 }
 0x491   : > { %v2174_v60 = vpack.c.bf16 %v1800_v55, %v1799_v57  ;;  %2725 = vrcp.f32 %v1706_v24  ;;  %v1705_v23 = vadd.f32 1.0, %v2716_v59  ;;  %v1442_v25 = vpop.xlane.xlu0 %1441 }
 0x492   : > { %v1782_v17 = vmul.f32 %v1750_v52, %v3350_v7  ;;  %2727 = vpow2.f32 %v1687_v58 }
 0x493   : > { %2206 = vst [vmem:[%s3290_s2 + $0x8] sm:$0xff] %v2174_v60   ;;  %2729 = vrcp.f32 %v1705_v23 }
 0x494   : > { %v1798_v19 = vadd.f32 %v1782_v17, %v1766_v16  ;;  %2731 = vpow2.f32 %v1685_v15  ;;  %v1440_v6 = vpop.xlane.xlu1 %1439 }
 0x495   : > { %v1438_v61 = vpop.xlane.xlu0 %1437 }
 0x496   : > { %v2718_v0 = vpop.eup %2717  ;;  %v2169_v53 = vpack.c.bf16 %v1798_v19, %v1797_v18 }
 0x497   : > { %v2720_v32 = vpop.eup %2719  ;;  %v1756_v33 = vsub.f32 1.0, %v2718_v0  ;;  %v1772_v2 = vmul.f32 %v2718_v0, %v3392_v43 }
 0x498   : > { %v2722_v12 = vpop.eup %2721  ;;  %2170 = vst [vmem:[%s3290_s2] sm:$0xff] %v2169_v53   ;;  %v1755_v1 = vsub.f32 1.0, %v2720_v32  ;;  %v1648_v34 = vpop.xlane.xlu1 %1647  ;;  %v1771_v39 = vmul.f32 %v2720_v32, %v3389_v42 }
 0x499   : > { %v2724_v35 = vpop.eup %2723  ;;  %v1788_v7 = vmul.f32 %v1756_v33, %v3398_v45  ;;  %v1712_v5 = vadd.f32 1.0, %v2722_v12  ;;  %v1666_v37 = vsub.f32 %v1648_v34, %v1440_v6  ;;  %v1646_v36 = vpop.xlane.xlu0 %1645 }
 0x49a   : > { %v1787_v40 = vmul.f32 %v1755_v1, %v3395_v44  ;;  %v1711_v38 = vadd.f32 1.0, %v2724_v35  ;;  %v1665_v41 = vsub.f32 %v1646_v36, %v1438_v61 }
 0x49b   : > { %v1804_v50 = vadd.f32 %v1788_v7, %v1772_v2  ;;  %2733 = vrcp.f32 %v1712_v5  ;;  %v1695_v51 = vmul.f32 1.442695, %v1666_v37 }
 0x49c   : > { %v1803_v54 = vadd.f32 %v1787_v40, %v1771_v39  ;;  %2735 = vrcp.f32 %v1711_v38  ;;  %v1693_v56 = vmul.f32 1.442695, %v1665_v41  ;;  %v1652_v57 = vpop.xlane.xlu1 %1651 }
 0x49d   : > { %2737 = vpow2.f32 %v1695_v51  ;;  %v1668_v43 = vsub.f32 %v1652_v57, %v1444_v22  ;;  %v1650_v45 = vpop.xlane.xlu0 %1649 }
 0x49e   : > { %v2726_v55 = vpop.eup %2725  ;;  %v2184_v24 = vpack.c.bf16 %v1804_v50, %v1803_v54  ;;  %2739 = vpow2.f32 %v1693_v56  ;;  %v1667_v58 = vsub.f32 %v1650_v45, %v1442_v25 }
 0x49f   : > { %v2728_v42 = vpop.eup %2727  ;;  %v1754_v59 = vsub.f32 1.0, %v2726_v55  ;;  %v1699_v44 = vmul.f32 1.442695, %v1668_v43  ;;  %v1770_v23 = vmul.f32 %v2726_v55, %v3372_v27 }
 0x4a0   : > { %v2730_v13 = vpop.eup %2729  ;;  %2208 = vst [vmem:[%s3290_s2 + $0x18] sm:$0xff] %v2184_v24   ;;  %v1710_v52 = vadd.f32 1.0, %v2728_v42  ;;  %v1697_v15 = vmul.f32 1.442695, %v1667_v58 }
 0x4a1   : > { %v2732_v60 = vpop.eup %2731  ;;  %v1786_v14 = vmul.f32 %v1754_v59, %v3378_v29  ;;  %v1753_v16 = vsub.f32 1.0, %v2730_v13  ;;  %2741 = vpow2.f32 %v1699_v44  ;;  %v1769_v25 = vmul.f32 %v2730_v13, %v3369_v26 }
 0x4a2   : > { %2743 = vrcp.f32 %v1710_v52  ;;  %v1709_v22 = vadd.f32 1.0, %v2732_v60 }
 0x4a3   : > { %v1802_v17 = vadd.f32 %v1786_v14, %v1770_v23  ;;  %v1785_v18 = vmul.f32 %v1753_v16, %v3375_v28  ;;  %2745 = vpow2.f32 %v1697_v15 }
 0x4a4   : > { %2747 = vrcp.f32 %v1709_v22 }
 0x4a5   : > { %v1801_v19 = vadd.f32 %v1785_v18, %v1769_v25 }
 0x4a7   : > { %v2179_v6 = vpack.c.bf16 %v1802_v17, %v1801_v19 }
 0x4a8   : > { %v2734_v61 = vpop.eup %2733 }
 0x4a9   : > { %v2736_v0 = vpop.eup %2735  ;;  %2207 = vst [vmem:[%s3290_s2 + $0x10] sm:$0xff] %v2179_v6   ;;  %v1760_v53 = vsub.f32 1.0, %v2734_v61  ;;  %v1776_v33 = vmul.f32 %v2734_v61, %v3424_v63 }
 0x4aa   : > { %v2738_v27 = vpop.eup %2737  ;;  %v1759_v32 = vsub.f32 1.0, %v2736_v0  ;;  %v1775_v26 = vmul.f32 %v2736_v0, %v3421_v62 }
 0x4ab   : > { %v2740_v29 = vpop.eup %2739  ;;  %v1792_v12 = vmul.f32 %v1760_v53, %v3430_v4  ;;  %v1714_v1 = vadd.f32 1.0, %v2738_v27 }
 0x4ac   : > { %v1791_v28 = vmul.f32 %v1759_v32, %v3427_v3  ;;  %v1713_v34 = vadd.f32 1.0, %v2740_v29 }
 0x4ad   : > { %v1808_v35 = vadd.f32 %v1792_v12, %v1776_v33  ;;  %2749 = vrcp.f32 %v1714_v1 }
 0x4ae   : > { %v2742_v2 = vpop.eup %2741  ;;  %v1807_v7 = vadd.f32 %v1791_v28, %v1775_v26  ;;  %2751 = vrcp.f32 %v1713_v34 }
 0x4af   : > { %v2744_v5 = vpop.eup %2743  ;;  %v1716_v37 = vadd.f32 1.0, %v2742_v2 }
 0x4b0   : > { %v2746_v36 = vpop.eup %2745  ;;  %v2194_v39 = vpack.c.bf16 %v1808_v35, %v1807_v7  ;;  %v1758_v63 = vsub.f32 1.0, %v2744_v5  ;;  %v1774_v62 = vmul.f32 %v2744_v5, %v3404_v47 }
 0x4b1   : > { %v2748_v40 = vpop.eup %2747  ;;  %2753 = vrcp.f32 %v1716_v37  ;;  %v1715_v4 = vadd.f32 1.0, %v2746_v36 }
 0x4b2   : > { %2210 = vst [vmem:[%s3290_s2 + $0x28] sm:$0xff] %v2194_v39   ;;  %v1790_v3 = vmul.f32 %v1758_v63, %v3410_v49  ;;  %v1757_v38 = vsub.f32 1.0, %v2748_v40  ;;  %v1773_v50 = vmul.f32 %v2748_v40, %v3401_v46 }
 0x4b3   : > { %2755 = vrcp.f32 %v1715_v4 }
 0x4b4   : > { %v1806_v41 = vadd.f32 %v1790_v3, %v1774_v62  ;;  %v1789_v51 = vmul.f32 %v1757_v38, %v3407_v48 }
 0x4b6   : > { %v1805_v54 = vadd.f32 %v1789_v51, %v1773_v50 }
 0x4b8   : > { %v2189_v56 = vpack.c.bf16 %v1806_v41, %v1805_v54 }
 0x4ba   : > { %v2750_v57 = vpop.eup %2749  ;;  %2209 = vst [vmem:[%s3290_s2 + $0x20] sm:$0xff] %v2189_v56  }
 0x4bb   : > { %v2752_v43 = vpop.eup %2751  ;;  %v1762_v45 = vsub.f32 1.0, %v2750_v57  ;;  %v1778_v24 = vmul.f32 %v2750_v57, %v3436_v9 }
 0x4bc   : > { %v1761_v55 = vsub.f32 1.0, %v2752_v43  ;;  %v1777_v58 = vmul.f32 %v2752_v43, %v3433_v8 }
 0x4bd   : > { %v1794_v47 = vmul.f32 %v1762_v45, %v3442_v11 }
 0x4be   : > { %v2754_v49 = vpop.eup %2753  ;;  %v1793_v46 = vmul.f32 %v1761_v55, %v3439_v10 }
 0x4bf   : > { %v1810_v42 = vadd.f32 %v1794_v47, %v1778_v24  ;;  %v1764_v48 = vsub.f32 1.0, %v2754_v49  ;;  %v1780_v13 = vmul.f32 %v2754_v49, %v3456_v21 }
 0x4c0   : > { %v2756_v59 = vpop.eup %2755  ;;  %v1809_v44 = vadd.f32 %v1793_v46, %v1777_v58 }
 0x4c1   : > { %v1796_v52 = vmul.f32 %v1764_v48, %v3462_v31  ;;  %v1763_v15 = vsub.f32 1.0, %v2756_v59  ;;  %v1779_v23 = vmul.f32 %v2756_v59, %v3453_v20 }
 0x4c2   : > { %v2199_v60 = vpack.c.bf16 %v1810_v42, %v1809_v44 }
 0x4c3   : > { %v1812_v9 = vadd.f32 %v1796_v52, %v1780_v13  ;;  %v1795_v11 = vmul.f32 %v1763_v15, %v3459_v30 }
 0x4c4   : > { %2211 = vst [vmem:[%s3290_s2 + $0x30] sm:$0xff] %v2199_v60  }
 0x4c5   : > { %v1811_v8 = vadd.f32 %v1795_v11, %v1779_v23 }
 0x4c7   : > { %v2204_v14 = vpack.c.bf16 %v1812_v9, %v1811_v8 }
 0x4c9   : > { %2212 = vst [vmem:[%s3290_s2 + $0x38] sm:$0xff] %v2204_v14  }
 0x4ca PF: > { %s3733_s20 = sld [smem:[#allocation24_spill]]  ;;  %s1907_s25 = sshll.u32 %s3290_s2, 4  ;;  %s3589_s25 = int_to_ptr.vmem [resolvable:$true] %s1907_s25 }
 0x4cb   : > { %s3735_s18 = sld [smem:[#allocation30_spill]]  ;;  %s3593_s11 = scalar_lea.sflag [#allocation5], %s404_s26 }
 0x4cc   : > { %s3736_s15 = sld [smem:[#allocation36_spill]]  ;;  %s2835_s10 = scalar_lea.vmem %s3589_s25, 1024 }
 0x4cd   : > { %p2836_p11 = scmp.ne.s32.totalorder %s3589_s25, %s2835_s10  ;;  %s3011_s21 = smov [#allocation11]  }
 0x4ce   : > { %s2839_s27 = sshll.u32 %s3011_s21, 4  ;;  %s2840_s27 = int_to_ptr.vmem [resolvable:$false] %s2839_s27 }
 0x4cf   : > { %s2841_s3 = scalar_lea.vmem %s2840_s27, 2048  ;;  %p2842_p12 = scmp.lt.s32.totalorder %s3589_s25, %s2840_s27 }
 0x4d0   : > { %s2165_s23 = sshll.u32 %s3733_s20, 10  ;;  %p2843_p3 = scmp.lt.s32.totalorder %s2841_s3, %s2835_s10 }
 0x4d1   : > { %p3737_p1 = scmp.ne.s32.totalorder %s3735_s18, 0 }
 0x4d2   : > { %s3586_s24 = scalar_lea.hbm %s3736_s15, %s2165_s23  ;;  %p2844_p5 = por %p2843_p3, %p2842_p12 }
 0x4d3   : > { %p2837_p4 = pnand %p2836_p11, %p3737_p1 }
 0x4d5   : > { %p2838_p2 = pneg %p2837_p4 }
 0x4d7   : > { %p2845_p13 = pnand %p2844_p5, %p2838_p2 }
 0x4d9   : > { %2848 = shalt.err (!%p2845_p13)
}
 0x4da   : > { %s2849_s26 = scalar_lea.hbm %s3586_s24, 1024  ;;  %s2853_s6 = scalar_lea.hbm %s3736_s15, 2048 }
 0x4db   : > { %p2850_p6 = scmp.ne.s32.totalorder %s3586_s24, %s2849_s26  ;;  %p2854_p9 = scmp.lt.s32.totalorder %s3586_s24, %s3736_s15 }
 0x4dc   : > { %p2855_p7 = scmp.lt.s32.totalorder %s2853_s6, %s2849_s26 }
 0x4dd   : > { %p2851_p10 = pnand %p2850_p6, %p3737_p1 }
 0x4de   : > { %p2856_p0 = por %p2855_p7, %p2854_p9 }
 0x4df   : > { %p2852_p8 = pneg %p2851_p10 }
 0x4e1   : > { %p2857_p11 = pnand %p2856_p0, %p2852_p8 }
 0x4e3   : > { %2860 = shalt.err (!%p2857_p11)
}
 0x4e4   : > { %s3012_s20 = smov 64   ;;  %s3013_s30 = smov 4  }
 0x4e5   : > { %2424 = dma.vmem_to_hbm [thread:$0]  (%p3737_p1), %s3589_s25, 1024, %s3586_s24, %s3593_s11, %s3012_s20, %s3012_s20, %s3013_s30  }
 0x4e6 PF: > { %s3738_s23 = sld [smem:[#allocation20_spill]]  ;;  %p2441_p4 = scmp.ge.s32.totalorder %s2991_s14, 2 }
 0x4e7   : > { %s3739_s17 = sld [smem:[#allocation31_spill]] }
 0x4ec   : > { %s1922_s22 = sand.u32 1, %s3738_s23  }
 0x4ed   : > { %p3740_p2 = scmp.ne.s32.totalorder %s3739_s17, 0  ;;  %s1923_s10 = scalar_lea.sflag [#allocation5], %s1922_s22 }
 0x4ef   : > { %p2434_p12 = pnand %p2441_p4, %p3740_p2 }
 0x4f1   : > { %p2435_p3 = pneg %p2434_p12 }
 0x4f3   : > { %2934 = dma.done.wait (%p2435_p3), %s1923_s10, 1024  }
 0x4f4   : > { %2936 = vsyncadd (%p2435_p3), %s1923_s10, 4294966272  ;;  %s27_s14 = sadd.s32 1, %s2991_s14   ;;  %s3742_s24 = sld [smem:[#allocation21_spill]] }
 0x4f5   : > { %p3621_p5 = scmp.ge.s32.totalorder %s27_s14, 6   ;;  %s3743_s25 = sld [smem:[#allocation22_spill]] }
 0x4f6   : > { %s3744_s26 = sld [smem:[#allocation29_spill]]  ;;  %s3749_s27 = smov %s2955_s28 }
 0x4f7   : > { %s3745_s18 = sld [smem:[#allocation28_spill]]  ;;  %s3750_s28 = smov %s2959_s29 }
 0x4f8   : > { %s3746_s11 = sld [smem:[#allocation27_spill]]  ;;  %s3752_s30 = smov %s2967_s8 }
 0x4f9   : > { %s3747_s3 = sld [smem:[#allocation25_spill]]  ;;  %s3753_s8 = smov %s2971_s9 }
 0x4fa   : > { %s3748_s2 = sld [smem:[#allocation26_spill]]  ;;  %s3755_s10 = smov %s2983_s12 }
 0x4fc   :  { %26 = sbr.rel (!%p3621_p5) target bundleno = 19 (0x13), region = 128 }
 0x4fd   : > { %s3751_s29 = smov %s3745_s18 }
 0x4fe   : > { %s3754_s9 = smov %s3746_s11  ;;  %s3756_s11 = smov %s2987_s13 }
 0x4ff   : > { %s3757_s12 = smov %s3747_s3 }
 0x500   : > { %s3758_s13 = smov %s3748_s2 }
 0x501   :  { %1928 = vsyncpa [#allocation4], 1 }
 0x502   :  { %1930 = vsyncpa [#allocation4 + $0x1], 1 }
 0x503   :  { %1931 = vsyncpa [#allocation7], 1 }
 0x504   :  { %1933 = vsyncpa [#allocation7 + $0x1], 1 }
 0x505   :  { %1934 = vsyncpa [#allocation10], 1 }
 0x506   :  { %1935 = vsyncpa [#allocation5], 1 }
 0x507   :  { %1937 = vsyncpa [#allocation5 + $0x1], 1 }

</bundles_post_ra>
